<compile_context>
chip_gen: v7x
topology: tpu7x:2x2x1
jax: 0.10.0
libtpu: 0.0.40
codegen_flags: <defaults>
</compile_context>

<pallas_src>
import math

import jax
import jax.numpy as jnp
from jax import lax
from jax.experimental import pallas as pl
from jax.experimental.pallas import tpu as pltpu


_LANE = 128
_VMEM_BUDGET = 40 * 2**20   # per-step footprint target (v7x has 64 MiB VMEM per TC)
_VMEM_LIMIT = 48 * 2**20    # scoped VMEM limit passed to Mosaic (safe on v5e/v6e/v7x)


def _round_up(x, m):
    return ((x + m - 1) // m) * m


def _pick_bblk(B, Cin, HWp, C1, C2, M, feat_bytes, target_lanes=512):
    """How many batch elements to pack per grid step.

    Packs batches until the matmul lane (N) dimension reaches target_lanes, then shrinks
    if the per-step VMEM footprint (double-buffered blocks + weights + scratch) would
    exceed the budget (re-derived for v7x's 64 MiB VMEM)."""
    divisors = [d for d in range(1, B + 1) if B % d == 0]

    weights_bytes = 2 * 2 * (C1 * Cin + C2 * C1 + M * C2)   # bf16, double-buffered
    bias_bytes = 2 * 4 * _LANE * (C1 + C2 + M)              # (C,1) lane-pads to (C,128)

    def footprint(bb):
        n = bb * HWp
        x_blk = bb * Cin * HWp * 4
        feat_blk = bb * Cin * HWp * feat_bytes
        mask_blk = bb * HWp * 4
        scratch = Cin * n * 2 + _round_up(M, 8) * n * 4     # packed x (bf16) + logits (f32)
        return 2 * (x_blk + feat_blk + mask_blk) + weights_bytes + bias_bytes + scratch

    bblk = divisors[-1]
    for d in divisors:
        if d * HWp >= target_lanes:
            bblk = d
            break
    while bblk > 1 and footprint(bblk) > _VMEM_BUDGET:
        smaller = [d for d in divisors if d < bblk]
        bblk = smaller[-1] if smaller else 1
    return bblk


def _pick_chunk(n, target=512):
    """Largest multiple-of-128 chunk <= target that evenly divides n (n is a mult of 128)."""
    if n <= target:
        return n
    ch = target
    while n % ch != 0:
        ch -= _LANE
    return ch


def _build_kernel(Bblk, Cin, HWp, HW, M, CH, n_chunks):
    def kernel(x_ref, w1_ref, b1_ref, w2_ref, b2_ref, w3_ref, b3_ref,
               feat_ref, mask_ref, xcm_ref, logits_ref):
        # ---- 1) pack Bblk batch elements channel-major: xcm = (Cin, Bblk*HWp) bf16 ----
        # (static slice copies; this is the "view x as (Cin, Bblk*HW)" batch packing)
        for b in range(Bblk):
            xcm_ref[:, b * HWp:(b + 1) * HWp] = x_ref[b].astype(jnp.bfloat16)

        w1 = w1_ref[...]; b1 = b1_ref[...]
        w2 = w2_ref[...]; b2 = b2_ref[...]
        w3 = w3_ref[...]; b3 = b3_ref[...]

        # ---- 2) conv1x1 chain, chunked over the packed lane axis ----------------------
        # Chunking bounds the live (512, CH) f32 intermediate while keeping bias-add +
        # ReLU + bf16 cast fused per chunk (single pass, no full-width f32 h1/h2).
        def conv_chunk(off):
            xc = xcm_ref[:, pl.ds(off, CH)]                                   # (Cin, CH) bf16
            h1 = jnp.dot(w1, xc, preferred_element_type=jnp.float32) + b1     # (512, CH) f32
            h1 = jnp.maximum(h1, 0.0).astype(jnp.bfloat16)
            h2 = jnp.dot(w2, h1, preferred_element_type=jnp.float32) + b2     # (64, CH)  f32
            h2 = jnp.maximum(h2, 0.0).astype(jnp.bfloat16)
            lg = jnp.dot(w3, h2, preferred_element_type=jnp.float32) + b3     # (M, CH)   f32
            logits_ref[:, pl.ds(off, CH)] = lg

        if n_chunks == 1:
            conv_chunk(0)
        else:
            def body(c, carry):
                conv_chunk(pl.multiple_of(c * CH, _LANE))
                return carry
            lax.fori_loop(0, n_chunks, body, 0, unroll=(n_chunks <= 8))

        # ---- 3) per-batch spatial softmax -> max over mask channels -> feat -----------
        for b in range(Bblk):
            lg = logits_ref[:, b * HWp:(b + 1) * HWp]                         # (M, HWp) f32
            if HW != HWp:
                # lane padding: padded positions must not feed exp/sum
                valid = lax.broadcasted_iota(jnp.int32, (M, HWp), 1) < HW
                lg = jnp.where(valid, lg, -jnp.inf)
            mx = jnp.max(lg, axis=1, keepdims=True)                           # (M, 1)
            e = jnp.exp(lg - mx)
            s = jnp.sum(e, axis=1, keepdims=True)                             # (M, 1)
            soft = e * (1.0 / s)                 # exact reciprocal: each row sums to 1
            msk = jnp.max(soft, axis=0, keepdims=True)                        # (1, HWp)
            mask_ref[b] = msk.astype(mask_ref.dtype)                          # lane-dense
            feat_ref[b] = (x_ref[b] * msk).astype(feat_ref.dtype)             # lane-dense

    return kernel


def mask_module_forward(x_nchw, params, *, feat_dtype=None, lane_chunk=512,
                        target_lanes=512):
    """x_nchw: (B, Cin, H, W).  params: (w1,b1,w2,b2,w3,b3), weights (Cout, Cin)
    (ideally pre-cast to bf16 via prepare_params), biases (Cout, 1) f32.
    feat_dtype: optionally emit feat in bf16 to halve HBM writeback (useful on v5e).
    Returns (feat (B,Cin,H,W), mask (B,1,H,W))."""
    w1, b1, w2, b2, w3, b3 = params
    B, Cin, H, W = x_nchw.shape
    HW = H * W
    HWp = _round_up(HW, _LANE)
    C1, C2, M = w1.shape[0], w2.shape[0], w3.shape[0]
    feat_dtype = x_nchw.dtype if feat_dtype is None else jnp.dtype(feat_dtype)

    # bf16 weights for the MXU (f32 accumulation).  Prefer pre-cast params (prepare_params)
    # so this is a no-op here rather than a per-call HBM round trip.
    if w1.dtype != jnp.bfloat16:
        w1 = w1.astype(jnp.bfloat16)
    if w2.dtype != jnp.bfloat16:
        w2 = w2.astype(jnp.bfloat16)
    if w3.dtype != jnp.bfloat16:
        w3 = w3.astype(jnp.bfloat16)

    # NCHW -> (B, Cin, HW): pure reshape (no transpose / no extra HBM pass); pad HW to a
    # lane multiple so all kernel loads/stores are 128-lane dense.
    x_flat = x_nchw.reshape(B, Cin, HW)
    if HWp != HW:
        x_flat = jnp.pad(x_flat, ((0, 0), (0, 0), (0, HWp - HW)))

    Bblk = _pick_bblk(B, Cin, HWp, C1, C2, M, jnp.dtype(feat_dtype).itemsize,
                      target_lanes=target_lanes)
    N = Bblk * HWp
    CH = _pick_chunk(N, target=lane_chunk)
    n_chunks = N // CH

    kernel = _build_kernel(Bblk, Cin, HWp, HW, M, CH, n_chunks)

    feat_flat, mask_flat = pl.pallas_call(
        kernel,
        out_shape=(
            jax.ShapeDtypeStruct((B, Cin, HWp), feat_dtype),
            jax.ShapeDtypeStruct((B, 1, HWp), x_nchw.dtype),
        ),
        grid_spec=pltpu.PrefetchScalarGridSpec(
            num_scalar_prefetch=0,
            grid=(B // Bblk,),
            in_specs=[
                pl.BlockSpec((Bblk, Cin, HWp), lambda i: (i, 0, 0)),
                # Grid-invariant weights/biases: constant index_map -> no re-DMA per step.
                # TODO(synk): single-buffer these via pipeline_mode=pl.Buffered(1) once that
                # path is validated on the target jax/Mosaic version (saves ~1x weight VMEM).
                pl.BlockSpec((C1, Cin), lambda i: (0, 0)),
                pl.BlockSpec((C1, 1), lambda i: (0, 0)),
                pl.BlockSpec((C2, C1), lambda i: (0, 0)),
                pl.BlockSpec((C2, 1), lambda i: (0, 0)),
                pl.BlockSpec((M, C2), lambda i: (0, 0)),
                pl.BlockSpec((M, 1), lambda i: (0, 0)),
            ],
            out_specs=[
                pl.BlockSpec((Bblk, Cin, HWp), lambda i: (i, 0, 0)),
                pl.BlockSpec((Bblk, 1, HWp), lambda i: (i, 0, 0)),
            ],
            scratch_shapes=[
                pltpu.VMEM((Cin, N), jnp.bfloat16),   # batch-packed channel-major x
                pltpu.VMEM((M, N), jnp.float32),      # logits, streamed per chunk
            ],
        ),
        compiler_params=pltpu.CompilerParams(
            dimension_semantics=("parallel",),
            vmem_limit_bytes=_VMEM_LIMIT,
        ),
        # TODO(synk): on v7x with B == 1 add a second parallel grid axis splitting HWp
        # (two-pass softmax with shared stats) so both TensorCores are used.
    )(x_flat, w1, b1, w2, b2, w3, b3)

    if HWp != HW:
        feat_flat = feat_flat[:, :, :HW]
        mask_flat = mask_flat[:, :, :HW]
    feat = feat_flat.reshape(B, Cin, H, W)
    mask = mask_flat.reshape(B, 1, H, W)
    return feat, mask


def init_params(key, in_channels, num_masks):
    """Xavier-normal weights, zero biases (matches nn.init.xavier_normal + bias fill 0).
    Weights stored (Cout, Cin) so a 1x1 conv == (Cout, Cin) @ (Cin, N) matmul."""
    dims = [(in_channels, 512), (512, 64), (64, num_masks)]
    params = []
    for fan_in, fan_out in dims:
        key, sub = jax.random.split(key)
        std = math.sqrt(2.0 / (fan_in + fan_out))
        w = std * jax.random.normal(sub, (fan_out, fan_in), dtype=jnp.float32)
        b = jnp.zeros((fan_out, 1), dtype=jnp.float32)
        params += [w, b]
    return tuple(params)


def prepare_params(params):
    """Cast conv weights to bf16 once, outside the hot forward path."""
    w1, b1, w2, b2, w3, b3 = params
    return (w1.astype(jnp.bfloat16), b1, w2.astype(jnp.bfloat16), b2,
            w3.astype(jnp.bfloat16), b3)


def _reference_forward(x_nchw, params):
    """Pure-JAX f32 reference (weights upcast from whatever dtype they are stored in)."""
    w1, b1, w2, b2, w3, b3 = (p.astype(jnp.float32) for p in params)
    B, Cin, H, W = x_nchw.shape
    xp = x_nchw.reshape(B, Cin, H * W).astype(jnp.float32)     # (B, Cin, HW)
    h1 = jnp.maximum(jnp.matmul(w1, xp) + b1, 0.0)             # (B, 512, HW)
    h2 = jnp.maximum(jnp.matmul(w2, h1) + b2, 0.0)             # (B, 64, HW)
    logits = jnp.matmul(w3, h2) + b3                           # (B, M, HW)
    soft = jax.nn.softmax(logits, axis=-1)                     # softmax over spatial
    mask = jnp.max(soft, axis=1, keepdims=True)                # (B, 1, HW)
    feat = xp * mask
    return feat.reshape(B, Cin, H, W), mask.reshape(B, 1, H, W)


if __name__ == "__main__":
    num_masks = 20
    key = jax.random.PRNGKey(0)
    kx, kp, kx2 = jax.random.split(key, 3)

    params = prepare_params(init_params(kp, 4, num_masks))   # bf16 weights, f32 biases

    # Case 1: HW is 128-aligned; batch packing gives a 512-lane matmul N dim, 1 chunk.
    x = jax.random.normal(kx, (2, 4, 16, 16), dtype=jnp.float32)
    feat, mask = mask_module_forward(x, params)
    feat = jax.block_until_ready(feat)
    mask = jax.block_until_ready(mask)
    feat_ref, mask_ref = _reference_forward(x, params)
    assert feat.shape == (2, 4, 16, 16) and mask.shape == (2, 1, 16, 16)
    # bf16 matmul activations vs f32 reference -> slightly loosened tolerances.
    assert jnp.allclose(feat, feat_ref, rtol=2e-2, atol=1e-3)
    assert jnp.allclose(mask, mask_ref, rtol=2e-2, atol=1e-3)

    # Case 2: exercise the chunked conv-chain loop (2 chunks of 256 lanes).
    feat2, mask2 = mask_module_forward(x, params, lane_chunk=256)
    feat2 = jax.block_until_ready(feat2)
    mask2 = jax.block_until_ready(mask2)
    assert jnp.allclose(feat2, feat_ref, rtol=2e-2, atol=1e-3)
    assert jnp.allclose(mask2, mask_ref, rtol=2e-2, atol=1e-3)

    # Case 3: HW not a multiple of 128 -> lane padding + (-inf) softmax-masking path.
    x3 = jax.random.normal(kx2, (2, 4, 16, 12), dtype=jnp.float32)
    feat3, mask3 = mask_module_forward(x3, params)
    feat3 = jax.block_until_ready(feat3)
    mask3 = jax.block_until_ready(mask3)
    feat3_ref, mask3_ref = _reference_forward(x3, params)
    assert feat3.shape == (2, 4, 16, 12) and mask3.shape == (2, 1, 16, 12)
    assert jnp.allclose(feat3, feat3_ref, rtol=2e-2, atol=1e-3)
    assert jnp.allclose(mask3, mask3_ref, rtol=2e-2, atol=1e-3)

    print("KERNEL_OK")
</pallas_src>

<mosaic_0001>
module attributes {stable_mosaic.version = 11 : i64} {
  func.func @kernel(%arg0: i32, %arg1: memref<2x4x256xf32, #tpu.memory_space<vmem>>, %arg2: memref<512x4xbf16, #tpu.memory_space<vmem>>, %arg3: memref<512x1xf32, #tpu.memory_space<vmem>>, %arg4: memref<64x512xbf16, #tpu.memory_space<vmem>>, %arg5: memref<64x1xf32, #tpu.memory_space<vmem>>, %arg6: memref<20x64xbf16, #tpu.memory_space<vmem>>, %arg7: memref<20x1xf32, #tpu.memory_space<vmem>>, %arg8: memref<2x4x256xf32, #tpu.memory_space<vmem>>, %arg9: memref<2x1x256xf32, #tpu.memory_space<vmem>>, %arg10: memref<4x512xbf16, #tpu.memory_space<vmem>>, %arg11: memref<20x512xf32, #tpu.memory_space<vmem>>) attributes {dimension_semantics = [#tpu.dimension_semantics<parallel>], iteration_bounds = array<i64: 1>, scalar_prefetch = 0 : i64, scratch_operands = 2 : i64, tpu.core_type = #tpu.core_type<tc>, window_params = [{transform_indices = @transform_0, window_bounds = array<i64: 2, 4, 256>}, {pipeline_mode = #tpu.pipeline_mode<synchronous>, transform_indices = @transform_1, window_bounds = array<i64: 512, 4>}, {pipeline_mode = #tpu.pipeline_mode<synchronous>, transform_indices = @transform_2, window_bounds = array<i64: 512, 1>}, {pipeline_mode = #tpu.pipeline_mode<synchronous>, transform_indices = @transform_3, window_bounds = array<i64: 64, 512>}, {pipeline_mode = #tpu.pipeline_mode<synchronous>, transform_indices = @transform_4, window_bounds = array<i64: 64, 1>}, {pipeline_mode = #tpu.pipeline_mode<synchronous>, transform_indices = @transform_5, window_bounds = array<i64: 20, 64>}, {pipeline_mode = #tpu.pipeline_mode<synchronous>, transform_indices = @transform_6, window_bounds = array<i64: 20, 1>}, {transform_indices = @transform_7, window_bounds = array<i64: 2, 4, 256>}, {transform_indices = @transform_8, window_bounds = array<i64: 2, 1, 256>}]} {
    %c0 = arith.constant 0 : index
    %c0_0 = arith.constant 0 : index
    %c0_1 = arith.constant 0 : index
    %0 = vector.load %arg1[%c0, %c0_0, %c0_1] : memref<2x4x256xf32, #tpu.memory_space<vmem>>, vector<1x4x256xf32>
    %1 = vector.shape_cast %0 : vector<1x4x256xf32> to vector<4x256xf32>
    %2 = arith.truncf %1 : vector<4x256xf32> to vector<4x256xbf16>
    %c0_2 = arith.constant 0 : index
    %c0_3 = arith.constant 0 : index
    %3 = vector.load %arg10[%c0_2, %c0_3] : memref<4x512xbf16, #tpu.memory_space<vmem>>, vector<4x256xbf16>
    tpu.vector_store %arg10[%c0_2, %c0_3], %2 {strides = array<i32>} : memref<4x512xbf16, #tpu.memory_space<vmem>>, vector<4x256xbf16>,
    %c1 = arith.constant 1 : index
    %c0_4 = arith.constant 0 : index
    %c0_5 = arith.constant 0 : index
    %4 = vector.load %arg1[%c1, %c0_4, %c0_5] : memref<2x4x256xf32, #tpu.memory_space<vmem>>, vector<1x4x256xf32>
    %5 = vector.shape_cast %4 : vector<1x4x256xf32> to vector<4x256xf32>
    %6 = arith.truncf %5 : vector<4x256xf32> to vector<4x256xbf16>
    %c0_6 = arith.constant 0 : index
    %c256 = arith.constant 256 : index
    %7 = vector.load %arg10[%c0_6, %c256] : memref<4x512xbf16, #tpu.memory_space<vmem>>, vector<4x256xbf16>
    tpu.vector_store %arg10[%c0_6, %c256], %6 {strides = array<i32>} : memref<4x512xbf16, #tpu.memory_space<vmem>>, vector<4x256xbf16>,
    %c0_7 = arith.constant 0 : index
    %c0_8 = arith.constant 0 : index
    %8 = vector.load %arg2[%c0_7, %c0_8] : memref<512x4xbf16, #tpu.memory_space<vmem>>, vector<512x4xbf16>
    %c0_9 = arith.constant 0 : index
    %c0_10 = arith.constant 0 : index
    %9 = vector.load %arg3[%c0_9, %c0_10] : memref<512x1xf32, #tpu.memory_space<vmem>>, vector<512x1xf32>
    %c0_11 = arith.constant 0 : index
    %c0_12 = arith.constant 0 : index
    %10 = vector.load %arg4[%c0_11, %c0_12] : memref<64x512xbf16, #tpu.memory_space<vmem>>, vector<64x512xbf16>
    %c0_13 = arith.constant 0 : index
    %c0_14 = arith.constant 0 : index
    %11 = vector.load %arg5[%c0_13, %c0_14] : memref<64x1xf32, #tpu.memory_space<vmem>>, vector<64x1xf32>
    %c0_15 = arith.constant 0 : index
    %c0_16 = arith.constant 0 : index
    %12 = vector.load %arg6[%c0_15, %c0_16] : memref<20x64xbf16, #tpu.memory_space<vmem>>, vector<20x64xbf16>
    %c0_17 = arith.constant 0 : index
    %c0_18 = arith.constant 0 : index
    %13 = vector.load %arg7[%c0_17, %c0_18] : memref<20x1xf32, #tpu.memory_space<vmem>>, vector<20x1xf32>
    %c0_19 = arith.constant 0 : index
    %c0_20 = arith.constant 0 : index
    %14 = vector.load %arg10[%c0_19, %c0_20] : memref<4x512xbf16, #tpu.memory_space<vmem>>, vector<4x512xbf16>
    %cst = arith.constant dense<0.000000e+00> : vector<512x512xf32>
    %15 = tpu.matmul %8, %14, %cst {dimension_numbers = #tpu.dot_dimension_numbers<[1], [0], [0], [1], [0, 0, 1, 1], [], []>} : vector<512x4xbf16>, vector<4x512xbf16>, vector<512x512xf32> -> vector<512x512xf32>
    %16 = vector.broadcast %9 : vector<512x1xf32> to vector<512x512xf32>
    %17 = arith.addf %15, %16 : vector<512x512xf32>
    %cst_21 = arith.constant 0.000000e+00 : f32
    %18 = vector.broadcast %cst_21 : f32 to vector<512x512xf32>
    %19 = arith.maximumf %17, %18 : vector<512x512xf32>
    %20 = arith.truncf %19 : vector<512x512xf32> to vector<512x512xbf16>
    %cst_22 = arith.constant dense<0.000000e+00> : vector<64x512xf32>
    %21 = tpu.matmul %10, %20, %cst_22 {dimension_numbers = #tpu.dot_dimension_numbers<[1], [0], [0], [1], [0, 0, 1, 1], [], []>} : vector<64x512xbf16>, vector<512x512xbf16>, vector<64x512xf32> -> vector<64x512xf32>
    %22 = vector.broadcast %11 : vector<64x1xf32> to vector<64x512xf32>
    %23 = arith.addf %21, %22 : vector<64x512xf32>
    %cst_23 = arith.constant 0.000000e+00 : f32
    %24 = vector.broadcast %cst_23 : f32 to vector<64x512xf32>
    %25 = arith.maximumf %23, %24 : vector<64x512xf32>
    %26 = arith.truncf %25 : vector<64x512xf32> to vector<64x512xbf16>
    %cst_24 = arith.constant dense<0.000000e+00> : vector<20x512xf32>
    %27 = tpu.matmul %12, %26, %cst_24 {dimension_numbers = #tpu.dot_dimension_numbers<[1], [0], [0], [1], [0, 0, 1, 1], [], []>} : vector<20x64xbf16>, vector<64x512xbf16>, vector<20x512xf32> -> vector<20x512xf32>
    %28 = vector.broadcast %13 : vector<20x1xf32> to vector<20x512xf32>
    %29 = arith.addf %27, %28 : vector<20x512xf32>
    %c0_25 = arith.constant 0 : index
    %c0_26 = arith.constant 0 : index
    %30 = vector.load %arg11[%c0_25, %c0_26] : memref<20x512xf32, #tpu.memory_space<vmem>>, vector<20x512xf32>
    tpu.vector_store %arg11[%c0_25, %c0_26], %29 {strides = array<i32>} : memref<20x512xf32, #tpu.memory_space<vmem>>, vector<20x512xf32>,
    %c0_27 = arith.constant 0 : index
    %c0_28 = arith.constant 0 : index
    %31 = vector.load %arg11[%c0_27, %c0_28] : memref<20x512xf32, #tpu.memory_space<vmem>>, vector<20x256xf32>
    %cst_29 = arith.constant dense<0xFF800000> : vector<20xf32>
    %32 = vector.multi_reduction <maximumf>, %31, %cst_29 [1] : vector<20x256xf32> to vector<20xf32>
    %33 = vector.shape_cast %32 : vector<20xf32> to vector<20x1xf32>
    %34 = vector.broadcast %33 : vector<20x1xf32> to vector<20x256xf32>
    %35 = arith.subf %31, %34 : vector<20x256xf32>
    %36 = math.exp %35 : vector<20x256xf32>
    %cst_30 = arith.constant dense<0.000000e+00> : vector<20xf32>
    %37 = vector.multi_reduction <add>, %36, %cst_30 [1] : vector<20x256xf32> to vector<20xf32>
    %38 = vector.shape_cast %37 : vector<20xf32> to vector<20x1xf32>
    %cst_31 = arith.constant 1.000000e+00 : f32
    %39 = vector.broadcast %cst_31 : f32 to vector<20x1xf32>
    %40 = arith.divf %39, %38 : vector<20x1xf32>
    %41 = vector.broadcast %40 : vector<20x1xf32> to vector<20x256xf32>
    %42 = arith.mulf %36, %41 : vector<20x256xf32>
    %cst_32 = arith.constant dense<0xFF800000> : vector<256xf32>
    %43 = vector.multi_reduction <maximumf>, %42, %cst_32 [0] : vector<20x256xf32> to vector<256xf32>
    %44 = vector.shape_cast %43 : vector<256xf32> to vector<1x256xf32>
    %c0_33 = arith.constant 0 : index
    %c0_34 = arith.constant 0 : index
    %c0_35 = arith.constant 0 : index
    %45 = vector.load %arg9[%c0_33, %c0_34, %c0_35] : memref<2x1x256xf32, #tpu.memory_space<vmem>>, vector<1x1x256xf32>
    %46 = vector.shape_cast %45 : vector<1x1x256xf32> to vector<1x256xf32>
    %47 = vector.shape_cast %44 : vector<1x256xf32> to vector<1x1x256xf32>
    tpu.vector_store %arg9[%c0_33, %c0_34, %c0_35], %47 {strides = array<i32>} : memref<2x1x256xf32, #tpu.memory_space<vmem>>, vector<1x1x256xf32>,
    %c0_36 = arith.constant 0 : index
    %c0_37 = arith.constant 0 : index
    %c0_38 = arith.constant 0 : index
    %48 = vector.load %arg1[%c0_36, %c0_37, %c0_38] : memref<2x4x256xf32, #tpu.memory_space<vmem>>, vector<1x4x256xf32>
    %49 = vector.shape_cast %48 : vector<1x4x256xf32> to vector<4x256xf32>
    %50 = vector.broadcast %44 : vector<1x256xf32> to vector<4x256xf32>
    %51 = arith.mulf %49, %50 : vector<4x256xf32>
    %c0_39 = arith.constant 0 : index
    %c0_40 = arith.constant 0 : index
    %c0_41 = arith.constant 0 : index
    %52 = vector.load %arg8[%c0_39, %c0_40, %c0_41] : memref<2x4x256xf32, #tpu.memory_space<vmem>>, vector<1x4x256xf32>
    %53 = vector.shape_cast %52 : vector<1x4x256xf32> to vector<4x256xf32>
    %54 = vector.shape_cast %51 : vector<4x256xf32> to vector<1x4x256xf32>
    tpu.vector_store %arg8[%c0_39, %c0_40, %c0_41], %54 {strides = array<i32>} : memref<2x4x256xf32, #tpu.memory_space<vmem>>, vector<1x4x256xf32>,
    %c0_42 = arith.constant 0 : index
    %c256_43 = arith.constant 256 : index
    %55 = vector.load %arg11[%c0_42, %c256_43] : memref<20x512xf32, #tpu.memory_space<vmem>>, vector<20x256xf32>
    %cst_44 = arith.constant dense<0xFF800000> : vector<20xf32>
    %56 = vector.multi_reduction <maximumf>, %55, %cst_44 [1] : vector<20x256xf32> to vector<20xf32>
    %57 = vector.shape_cast %56 : vector<20xf32> to vector<20x1xf32>
    %58 = vector.broadcast %57 : vector<20x1xf32> to vector<20x256xf32>
    %59 = arith.subf %55, %58 : vector<20x256xf32>
    %60 = math.exp %59 : vector<20x256xf32>
    %cst_45 = arith.constant dense<0.000000e+00> : vector<20xf32>
    %61 = vector.multi_reduction <add>, %60, %cst_45 [1] : vector<20x256xf32> to vector<20xf32>
    %62 = vector.shape_cast %61 : vector<20xf32> to vector<20x1xf32>
    %cst_46 = arith.constant 1.000000e+00 : f32
    %63 = vector.broadcast %cst_46 : f32 to vector<20x1xf32>
    %64 = arith.divf %63, %62 : vector<20x1xf32>
    %65 = vector.broadcast %64 : vector<20x1xf32> to vector<20x256xf32>
    %66 = arith.mulf %60, %65 : vector<20x256xf32>
    %cst_47 = arith.constant dense<0xFF800000> : vector<256xf32>
    %67 = vector.multi_reduction <maximumf>, %66, %cst_47 [0] : vector<20x256xf32> to vector<256xf32>
    %68 = vector.shape_cast %67 : vector<256xf32> to vector<1x256xf32>
    %c1_48 = arith.constant 1 : index
    %c0_49 = arith.constant 0 : index
    %c0_50 = arith.constant 0 : index
    %69 = vector.load %arg9[%c1_48, %c0_49, %c0_50] : memref<2x1x256xf32, #tpu.memory_space<vmem>>, vector<1x1x256xf32>
    %70 = vector.shape_cast %69 : vector<1x1x256xf32> to vector<1x256xf32>
    %71 = vector.shape_cast %68 : vector<1x256xf32> to vector<1x1x256xf32>
    tpu.vector_store %arg9[%c1_48, %c0_49, %c0_50], %71 {strides = array<i32>} : memref<2x1x256xf32, #tpu.memory_space<vmem>>, vector<1x1x256xf32>,
    %c1_51 = arith.constant 1 : index
    %c0_52 = arith.constant 0 : index
    %c0_53 = arith.constant 0 : index
    %72 = vector.load %arg1[%c1_51, %c0_52, %c0_53] : memref<2x4x256xf32, #tpu.memory_space<vmem>>, vector<1x4x256xf32>
    %73 = vector.shape_cast %72 : vector<1x4x256xf32> to vector<4x256xf32>
    %74 = vector.broadcast %68 : vector<1x256xf32> to vector<4x256xf32>
    %75 = arith.mulf %73, %74 : vector<4x256xf32>
    %c1_54 = arith.constant 1 : index
    %c0_55 = arith.constant 0 : index
    %c0_56 = arith.constant 0 : index
    %76 = vector.load %arg8[%c1_54, %c0_55, %c0_56] : memref<2x4x256xf32, #tpu.memory_space<vmem>>, vector<1x4x256xf32>
    %77 = vector.shape_cast %76 : vector<1x4x256xf32> to vector<4x256xf32>
    %78 = vector.shape_cast %75 : vector<4x256xf32> to vector<1x4x256xf32>
    tpu.vector_store %arg8[%c1_54, %c0_55, %c0_56], %78 {strides = array<i32>} : memref<2x4x256xf32, #tpu.memory_space<vmem>>, vector<1x4x256xf32>,
    return
  }
  func.func @transform_0(%arg0: i32) -> (i32, i32, i32) {
    %c0_i32 = arith.constant 0 : i32
    %c0_i32_0 = arith.constant 0 : i32
    %c0_i32_1 = arith.constant 0 : i32
    return %arg0, %c0_i32, %c0_i32_0 : i32, i32, i32
  }
  func.func @transform_1(%arg0: i32) -> (i32, i32) {
    %c0_i32 = arith.constant 0 : i32
    %c0_i32_0 = arith.constant 0 : i32
    %c0_i32_1 = arith.constant 0 : i32
    return %c0_i32, %c0_i32_0 : i32, i32
  }
  func.func @transform_2(%arg0: i32) -> (i32, i32) {
    %c0_i32 = arith.constant 0 : i32
    %c0_i32_0 = arith.constant 0 : i32
    %c0_i32_1 = arith.constant 0 : i32
    return %c0_i32, %c0_i32_0 : i32, i32
  }
  func.func @transform_3(%arg0: i32) -> (i32, i32) {
    %c0_i32 = arith.constant 0 : i32
    %c0_i32_0 = arith.constant 0 : i32
    %c0_i32_1 = arith.constant 0 : i32
    return %c0_i32, %c0_i32_0 : i32, i32
  }
  func.func @transform_4(%arg0: i32) -> (i32, i32) {
    %c0_i32 = arith.constant 0 : i32
    %c0_i32_0 = arith.constant 0 : i32
    %c0_i32_1 = arith.constant 0 : i32
    return %c0_i32, %c0_i32_0 : i32, i32
  }
  func.func @transform_5(%arg0: i32) -> (i32, i32) {
    %c0_i32 = arith.constant 0 : i32
    %c0_i32_0 = arith.constant 0 : i32
    %c0_i32_1 = arith.constant 0 : i32
    return %c0_i32, %c0_i32_0 : i32, i32
  }
  func.func @transform_6(%arg0: i32) -> (i32, i32) {
    %c0_i32 = arith.constant 0 : i32
    %c0_i32_0 = arith.constant 0 : i32
    %c0_i32_1 = arith.constant 0 : i32
    return %c0_i32, %c0_i32_0 : i32, i32
  }
  func.func @transform_7(%arg0: i32) -> (i32, i32, i32) {
    %c0_i32 = arith.constant 0 : i32
    %c0_i32_0 = arith.constant 0 : i32
    %c0_i32_1 = arith.constant 0 : i32
    return %arg0, %c0_i32, %c0_i32_0 : i32, i32, i32
  }
  func.func @transform_8(%arg0: i32) -> (i32, i32, i32) {
    %c0_i32 = arith.constant 0 : i32
    %c0_i32_0 = arith.constant 0 : i32
    %c0_i32_1 = arith.constant 0 : i32
    return %arg0, %c0_i32, %c0_i32_0 : i32, i32, i32
  }
}

</mosaic_0001>

<bundles_post_ra>
// kernel: tpu_custom_call.1
= control target key start
LH: loop header
LB: loop body
LE: loop exit
PB: predicated region body
PF: predicated region fallthrough
CT: control target
= control target key end

     0   :  { %14 = vsyncpa [#allocation5], 0  ;;  %v3112_v2 = vmov 0   ;;  %v3113_v9 = vmov 1983009808   ;;  %v712_v11 = vlaneseq  ;;  %vm822_vm0 = vcmask 1041408   ;;  %s3780_s0 = inlined_call_operand.vmem [shape: f32[2,4,256], index: 0, kind: input, shape index: {}]   ;;  %s3781_s1 = inlined_call_operand.vmem [shape: bf16[512,4], index: 1, kind: input, shape index: {}]   ;;  %s3782_s2 = inlined_call_operand.vmem [shape: f32[512,1], index: 2, kind: input, shape index: {}]   ;;  %s3783_s3 = inlined_call_operand.vmem [shape: bf16[64,512], index: 3, kind: input, shape index: {}]   ;;  %s3784_s4 = inlined_call_operand.vmem [shape: f32[64,1], index: 4, kind: input, shape index: {}]   ;;  %s3785_s5 = inlined_call_operand.vmem [shape: bf16[20,64], index: 5, kind: input, shape index: {}]   ;;  %s3786_s6 = inlined_call_operand.vmem [shape: f32[20,1], index: 6, kind: input, shape index: {}]   ;;  %s3787_s7 = inlined_call_operand.hbm [shape: f32[2,4,256], index: 7, kind: output, shape index: {0}]   ;;  %s3788_s8 = inlined_call_operand.hbm [shape: f32[2,1,256], index: 8, kind: output, shape index: {1}]  }
   0x1   :  { %v134_v0 = vld [vmem:[%s3782_s2 + $0x10] sm:$0xff]  ;;  %v132_v1 = vld [vmem:[%s3782_s2] sm:$0xff]  ;;  %2966 = vset.pattern.permute.xlu1 %v3112_v2  ;;  %2965 = vset.pattern.permute.xlu0 %v3112_v2  ;;  %v135_v4 = vld [vmem:[%s3782_s2 + $0x18] sm:$0xff]  ;;  %v710_v10 = vunpack.c.l.s4 %v3113_v9  ;;  %vm725_vm1 = vcmask 31744  }
   0x2   :  { %239 = vperm.xlu1 %2966, %v134_v0   ;;  %229 = vperm.xlu0 %2965, %v132_v1   ;;  %v31_v3 = vld [vmem:[%s3780_s0] sm:$0xff]  ;;  %v133_v5 = vld [vmem:[%s3782_s2 + $0x8] sm:$0xff]  ;;  %v3195_v17 = vshrl.u32 %v712_v11, 7  ;;  %v139_v18 = vld [vmem:[%s3782_s2 + $0x38] sm:$0xff] }
   0x3   :  { %v33_v6 = vcombine.high %v31_v3, %v31_v3  ;;  %v2768_v7 = vld [vmem:[%s3780_s0 + $0x8] sm:$0xff]  ;;  %867 = vmatprep.mubr.bf16.mxu0 %v3112_v2  ;;  %1220 = vmatprep.mubr.bf16.mxu1 %v3112_v2  ;;  %v136_v15 = vld [vmem:[%s3782_s2 + $0x20] sm:$0xff]  ;;  %v711_v16 = vunpack.c.0.s8 %v710_v10  ;;  %v138_v19 = vld [vmem:[%s3782_s2 + $0x30] sm:$0xff] }
   0x4   :  { %v52_v8 = vcombine.high %v2768_v7, %v2768_v7  ;;  %v137_v14 = vld [vmem:[%s3782_s2 + $0x28] sm:$0xff]  ;;  %v140_v23 = vld [vmem:[%s3782_s2 + $0x40] sm:$0xff]  ;;  %v143_v29 = vld [vmem:[%s3782_s2 + $0x58] sm:$0xff] }
   0x5   :  { %v2766_v12 = vpack.c.bf16 %v33_v6, %v31_v3  ;;  %v714_v20 = vsub.s32 %v711_v16, %v3195_v17  ;;  %v141_v22 = vld [vmem:[%s3782_s2 + $0x48] sm:$0xff]  ;;  %v2970_v32 = vld [vmem:[%s3781_s1] sm:$0xff]   ;;  %v142_v33 = vld [vmem:[%s3782_s2 + $0x50] sm:$0xff] }
   0x6   :  { %244 = vperm.xlu1 %2966, %v135_v4   ;;  %234 = vperm.xlu0 %2965, %v133_v5   ;;  %v2769_v13 = vpack.c.bf16 %v52_v8, %v2768_v7  ;;  %v145_v34 = vld [vmem:[%s3782_s2 + $0x68] sm:$0xff]  ;;  %v144_v35 = vld [vmem:[%s3782_s2 + $0x60] sm:$0xff]  ;;  %v147_v36 = vld [vmem:[%s3782_s2 + $0x78] sm:$0xff] }
   0x7   :  { %2767 = vst.sshfl [vmem:[#allocation2] sm:$0x33 pattern:$0x76325410] %v2766_v12  ;;  %v2971_v37 = vld [vmem:[%s3781_s1 + $0x8] sm:$0xff]   ;;  %v146_v38 = vld [vmem:[%s3782_s2 + $0x70] sm:$0xff] }
   0x8   :  { %2770 = vst.sshfl [vmem:[#allocation2 + $0x4] sm:$0x33 pattern:$0x76325410] %v2769_v13  ;;  %v149_v39 = vld [vmem:[%s3782_s2 + $0x88] sm:$0xff]  ;;  %v148_v40 = vld [vmem:[%s3782_s2 + $0x80] sm:$0xff] }
   0x9   :  { %v151_v41 = vld [vmem:[%s3782_s2 + $0x98] sm:$0xff]  ;;  %v2972_v42 = vld [vmem:[%s3781_s1 + $0x10] sm:$0xff]   ;;  %v153_v44 = vld [vmem:[%s3782_s2 + $0xa8] sm:$0xff] }
   0xa   :  { %254 = vperm.xlu1 %2966, %v137_v14   ;;  %249 = vperm.xlu0 %2965, %v136_v15   ;;  %v150_v43 = vld [vmem:[%s3782_s2 + $0x90] sm:$0xff]  ;;  %v152_v45 = vld [vmem:[%s3782_s2 + $0xa0] sm:$0xff]  ;;  %v2973_v46 = vld [vmem:[%s3781_s1 + $0x18] sm:$0xff]  }
   0xb   :  { %v155_v47 = vld [vmem:[%s3782_s2 + $0xb8] sm:$0xff]  ;;  %v154_v48 = vld [vmem:[%s3782_s2 + $0xb0] sm:$0xff]  ;;  %v157_v49 = vld [vmem:[%s3782_s2 + $0xc8] sm:$0xff] }
   0xc   :  { %v156_v50 = vld [vmem:[%s3782_s2 + $0xc0] sm:$0xff]  ;;  %v159_v51 = vld [vmem:[%s3782_s2 + $0xd8] sm:$0xff]  ;;  %v158_v53 = vld [vmem:[%s3782_s2 + $0xd0] sm:$0xff] }
   0xd   :  { %v2974_v52 = vld [vmem:[%s3781_s1 + $0x20] sm:$0xff]   ;;  %v161_v54 = vld [vmem:[%s3782_s2 + $0xe8] sm:$0xff]  ;;  %v163_v56 = vld [vmem:[%s3782_s2 + $0xf8] sm:$0xff] }
   0xe   :  { %264 = vperm.xlu1 %2966, %v139_v18   ;;  %259 = vperm.xlu0 %2965, %v138_v19   ;;  %v160_v55 = vld [vmem:[%s3782_s2 + $0xe0] sm:$0xff]  ;;  %v2975_v57 = vld [vmem:[%s3781_s1 + $0x28] sm:$0xff]   ;;  %v162_v58 = vld [vmem:[%s3782_s2 + $0xf0] sm:$0xff] }
   0xf   :  { %v226_v21 = vld [vmem:[#allocation2] sm:$0xff] }
  0x10   :  { %v715_v24 = vrot.slane %v226_v21, %v714_v20  ;;  %v708_v25 = vcombine.high %v226_v21, %v226_v21 }
  0x12   :  { %v723_v26 = vcombine.high %v715_v24, %v715_v24  ;;  %274 = vperm.xlu1 %2966, %v141_v22   ;;  %269 = vperm.xlu0 %2965, %v140_v23   ;;  %v824_v27 = vsel %vm822_vm0, %v715_v24, 0  ;;  %v722_v28 = vrot.slane %v708_v25, %v714_v20 }
  0x14   :  { %2803 = vmatprep.subr.msk.bf16.mxu0 %vm822_vm0, %v723_v26  ;;  %v724_v30 = vcombine.high %v722_v28, %v722_v28  ;;  %v830_v31 = vsel %vm822_vm0, %v722_v28, 0 }
  0x15   :  { %836 = vmatpush1.bf16.msra.mxu0 %v824_v27 }
  0x16   :  { %2836 = vmatprep.subr.msk.bf16.mxu1 %vm822_vm0, %v724_v30  ;;  %284 = vperm.xlu1 %2966, %v143_v29  }
  0x17   :  { %1189 = vmatpush1.bf16.msra.mxu1 %v830_v31  ;;  %279 = vperm.xlu0 %2965, %v142_v33  }
  0x18   :  { %2804 = vmatmul.mubr.msk.bf16.vlgmr.msra.gmra.mrb[0].mxu0 %vm725_vm1, %v2970_v32 }
  0x19   :  { %877 = vmatprep.mubr.bf16.mxu0 %v3112_v2 }
  0x1a   :  { %2837 = vmatmul.mubr.msk.bf16.vlgmr.msra.gmra.mrb[0].mxu1 %vm725_vm1, %v2970_v32  ;;  %294 = vperm.xlu1 %2966, %v145_v34  }
  0x1b   :  { %289 = vperm.xlu0 %2965, %v144_v35   ;;  %1230 = vmatprep.mubr.bf16.mxu1 %v3112_v2 }
  0x1e   :  { %304 = vperm.xlu1 %2966, %v147_v36  }
  0x1f   :  { %299 = vperm.xlu0 %2965, %v146_v38  }
  0x20   :  { %2805 = vmatmul.mubr.msk.bf16.gmra.mrb[4].mxu0 %vm725_vm1, %v2971_v37 }
  0x21   :  { %887 = vmatprep.mubr.bf16.mxu0 %v3112_v2 }
  0x22   :  { %2838 = vmatmul.mubr.msk.bf16.gmra.mrb[4].mxu1 %vm725_vm1, %v2971_v37  ;;  %314 = vperm.xlu1 %2966, %v149_v39  }
  0x23   :  { %309 = vperm.xlu0 %2965, %v148_v40   ;;  %1240 = vmatprep.mubr.bf16.mxu1 %v3112_v2 }
  0x26   :  { %324 = vperm.xlu1 %2966, %v151_v41  }
  0x27   :  { %319 = vperm.xlu0 %2965, %v150_v43  }
  0x28   :  { %2806 = vmatmul.mubr.msk.bf16.gmra.mrb[8].mxu0 %vm725_vm1, %v2972_v42 }
  0x29   :  { %897 = vmatprep.mubr.bf16.mxu0 %v3112_v2 }
  0x2a   :  { %2839 = vmatmul.mubr.msk.bf16.gmra.mrb[8].mxu1 %vm725_vm1, %v2972_v42  ;;  %334 = vperm.xlu1 %2966, %v153_v44  }
  0x2b   :  { %329 = vperm.xlu0 %2965, %v152_v45   ;;  %1250 = vmatprep.mubr.bf16.mxu1 %v3112_v2 }
  0x2e   :  { %344 = vperm.xlu1 %2966, %v155_v47  }
  0x2f   :  { %339 = vperm.xlu0 %2965, %v154_v48  }
  0x30   :  { %2807 = vmatmul.mubr.msk.bf16.gmra.mrb[12].mxu0 %vm725_vm1, %v2973_v46 }
  0x31   :  { %907 = vmatprep.mubr.bf16.mxu0 %v3112_v2 }
  0x32   :  { %2840 = vmatmul.mubr.msk.bf16.gmra.mrb[12].mxu1 %vm725_vm1, %v2973_v46  ;;  %354 = vperm.xlu1 %2966, %v157_v49  }
  0x33   :  { %349 = vperm.xlu0 %2965, %v156_v50   ;;  %1260 = vmatprep.mubr.bf16.mxu1 %v3112_v2 }
  0x36   :  { %364 = vperm.xlu1 %2966, %v159_v51  }
  0x37   :  { %359 = vperm.xlu0 %2965, %v158_v53  }
  0x38   :  { %2808 = vmatmul.mubr.msk.bf16.gmra.mrb[16].mxu0 %vm725_vm1, %v2974_v52 }
  0x39   :  { %917 = vmatprep.mubr.bf16.mxu0 %v3112_v2 }
  0x3a   :  { %2841 = vmatmul.mubr.msk.bf16.gmra.mrb[16].mxu1 %vm725_vm1, %v2974_v52  ;;  %374 = vperm.xlu1 %2966, %v161_v54  }
  0x3b   :  { %369 = vperm.xlu0 %2965, %v160_v55   ;;  %1270 = vmatprep.mubr.bf16.mxu1 %v3112_v2 }
  0x3c   :  { %15 = vsyncpa [#allocation7], 0  ;;  %v165_v59 = vld [vmem:[%s3782_s2 + $0x108] sm:$0xff]  ;;  %v164_v60 = vld [vmem:[%s3782_s2 + $0x100] sm:$0xff]  ;;  %vm2408_vm2 = vcmask 523264   ;;  %vm2541_vm3 = vcmask 1043456  }
  0x3d   :  { %v167_v61 = vld [vmem:[%s3782_s2 + $0x118] sm:$0xff]  ;;  %v2976_v62 = vld [vmem:[%s3781_s1 + $0x30] sm:$0xff]   ;;  %v169_v0 = vld [vmem:[%s3782_s2 + $0x128] sm:$0xff]  ;;  %s3115_s29 = smov [#allocation4]   ;;  %s3116_s9 = smov [#allocation6]   ;;  %vm3741_vm4 = vcmp.lt.s32.totalorder %v712_v11, 256 }
  0x3e   :  { %384 = vperm.xlu1 %2966, %v163_v56   ;;  %v166_v63 = vld [vmem:[%s3782_s2 + $0x110] sm:$0xff]  ;;  %v168_v1 = vld [vmem:[%s3782_s2 + $0x120] sm:$0xff]  ;;  %v171_v3 = vld [vmem:[%s3782_s2 + $0x138] sm:$0xff]  ;;  %s2739_s30 = sshll.u32 %s3115_s29, 4  ;;  %s2751_s10 = sshll.u32 %s3116_s9, 4  ;;  %s2740_s30 = int_to_ptr.vmem [resolvable:$true] %s2739_s30  ;;  %s3745_s10 = int_to_ptr.vmem [resolvable:$true] %s2751_s10 }
  0x3f   :  { %379 = vperm.xlu0 %2965, %v162_v58   ;;  %v2977_v4 = vld [vmem:[%s3781_s1 + $0x38] sm:$0xff]   ;;  %v170_v5 = vld [vmem:[%s3782_s2 + $0x130] sm:$0xff]  ;;  %v173_v6 = vld [vmem:[%s3782_s2 + $0x148] sm:$0xff]  ;;  %p3069_p1 = scmp.lt.s32.totalorder %s2740_s30, %s2740_s30 }
  0x40   :  { %2809 = vmatmul.mubr.msk.bf16.gmra.mrb[20].mxu0 %vm725_vm1, %v2975_v57  ;;  %v172_v7 = vld [vmem:[%s3782_s2 + $0x140] sm:$0xff]  ;;  %v175_v8 = vld [vmem:[%s3782_s2 + $0x158] sm:$0xff]  ;;  %v174_v10 = vld [vmem:[%s3782_s2 + $0x150] sm:$0xff] }
  0x41   :  { %927 = vmatprep.mubr.bf16.mxu0 %v3112_v2  ;;  %v2978_v9 = vld [vmem:[%s3781_s1 + $0x40] sm:$0xff]   ;;  %v177_v12 = vld [vmem:[%s3782_s2 + $0x168] sm:$0xff]  ;;  %v179_v14 = vld [vmem:[%s3782_s2 + $0x178] sm:$0xff] }
  0x42   :  { %2842 = vmatmul.mubr.msk.bf16.gmra.mrb[20].mxu1 %vm725_vm1, %v2975_v57  ;;  %394 = vperm.xlu1 %2966, %v165_v59   ;;  %v176_v13 = vld [vmem:[%s3782_s2 + $0x160] sm:$0xff]  ;;  %v2979_v15 = vld [vmem:[%s3781_s1 + $0x48] sm:$0xff]   ;;  %v178_v16 = vld [vmem:[%s3782_s2 + $0x170] sm:$0xff] }
  0x43   :  { %389 = vperm.xlu0 %2965, %v164_v60   ;;  %1280 = vmatprep.mubr.bf16.mxu1 %v3112_v2  ;;  %v181_v18 = vld [vmem:[%s3782_s2 + $0x188] sm:$0xff]  ;;  %v180_v19 = vld [vmem:[%s3782_s2 + $0x180] sm:$0xff]  ;;  %v183_v20 = vld [vmem:[%s3782_s2 + $0x198] sm:$0xff] }
  0x44   :  { %v2980_v21 = vld [vmem:[%s3781_s1 + $0x50] sm:$0xff]   ;;  %v185_v23 = vld [vmem:[%s3782_s2 + $0x1a8] sm:$0xff]  ;;  %v184_v24 = vld [vmem:[%s3782_s2 + $0x1a0] sm:$0xff] }
  0x45   :  { %v182_v22 = vld [vmem:[%s3782_s2 + $0x190] sm:$0xff]  ;;  %v187_v25 = vld [vmem:[%s3782_s2 + $0x1b8] sm:$0xff]  ;;  %v189_v28 = vld [vmem:[%s3782_s2 + $0x1c8] sm:$0xff] }
  0x46   :  { %404 = vperm.xlu1 %2966, %v167_v61   ;;  %v2981_v26 = vld [vmem:[%s3781_s1 + $0x58] sm:$0xff]   ;;  %v186_v27 = vld [vmem:[%s3782_s2 + $0x1b0] sm:$0xff]  ;;  %v188_v29 = vld [vmem:[%s3782_s2 + $0x1c0] sm:$0xff] }
  0x47   :  { %399 = vperm.xlu0 %2965, %v166_v63   ;;  %v191_v30 = vld [vmem:[%s3782_s2 + $0x1d8] sm:$0xff]  ;;  %v2982_v31 = vld [vmem:[%s3781_s1 + $0x60] sm:$0xff]   ;;  %v190_v32 = vld [vmem:[%s3782_s2 + $0x1d0] sm:$0xff] }
  0x48   :  { %2810 = vmatmul.mubr.msk.bf16.gmra.mrb[24].mxu0 %vm725_vm1, %v2976_v62  ;;  %v193_v33 = vld [vmem:[%s3782_s2 + $0x1e8] sm:$0xff]  ;;  %v192_v34 = vld [vmem:[%s3782_s2 + $0x1e0] sm:$0xff]  ;;  %v195_v35 = vld [vmem:[%s3782_s2 + $0x1f8] sm:$0xff] }
  0x49   :  { %937 = vmatprep.mubr.bf16.mxu0 %v3112_v2  ;;  %v2983_v36 = vld [vmem:[%s3781_s1 + $0x68] sm:$0xff]   ;;  %v194_v37 = vld [vmem:[%s3782_s2 + $0x1f0] sm:$0xff]  ;;  %v212_v39 = vld [vmem:[%s3784_s4] sm:$0xff] }
  0x4a   :  { %2843 = vmatmul.mubr.msk.bf16.gmra.mrb[24].mxu1 %vm725_vm1, %v2976_v62  ;;  %414 = vperm.xlu1 %2966, %v169_v0   ;;  %v213_v38 = vld [vmem:[%s3784_s4 + $0x8] sm:$0xff]  ;;  %v215_v40 = vld [vmem:[%s3784_s4 + $0x18] sm:$0xff]  ;;  %v2984_v41 = vld [vmem:[%s3781_s1 + $0x70] sm:$0xff]  }
  0x4b   :  { %409 = vperm.xlu0 %2965, %v168_v1   ;;  %1290 = vmatprep.mubr.bf16.mxu1 %v3112_v2  ;;  %v214_v42 = vld [vmem:[%s3784_s4 + $0x10] sm:$0xff]  ;;  %v217_v43 = vld [vmem:[%s3784_s4 + $0x28] sm:$0xff]  ;;  %v216_v44 = vld [vmem:[%s3784_s4 + $0x20] sm:$0xff] }
  0x4c   :  { %v219_v45 = vld [vmem:[%s3784_s4 + $0x38] sm:$0xff]  ;;  %v218_v47 = vld [vmem:[%s3784_s4 + $0x30] sm:$0xff]  ;;  %v223_v48 = vld [vmem:[%s3786_s6] sm:$0xff] }
  0x4d   :  { %v2985_v46 = vld [vmem:[%s3781_s1 + $0x78] sm:$0xff]   ;;  %v225_v49 = vld [vmem:[%s3786_s6 + $0x10] sm:$0xf]  ;;  %v2986_v50 = vld [vmem:[%s3781_s1 + $0x80] sm:$0xff]  }
  0x4e   :  { %424 = vperm.xlu1 %2966, %v171_v3   ;;  %v224_v51 = vld [vmem:[%s3786_s6 + $0x8] sm:$0xff]  ;;  %v2988_v53 = vld [vmem:[%s3781_s1 + $0x90] sm:$0xff]   ;;  %v2989_v54 = vld [vmem:[%s3781_s1 + $0x98] sm:$0xff]  }
  0x4f   :  { %419 = vperm.xlu0 %2965, %v170_v5   ;;  %v2987_v52 = vld [vmem:[%s3781_s1 + $0x88] sm:$0xff]   ;;  %v2990_v55 = vld [vmem:[%s3781_s1 + $0xa0] sm:$0xff]   ;;  %v2992_v57 = vld [vmem:[%s3781_s1 + $0xb0] sm:$0xff]  }
  0x50   :  { %2811 = vmatmul.mubr.msk.bf16.gmra.mrb[28].mxu0 %vm725_vm1, %v2977_v4  ;;  %v2991_v56 = vld [vmem:[%s3781_s1 + $0xa8] sm:$0xff]   ;;  %v2993_v58 = vld [vmem:[%s3781_s1 + $0xb8] sm:$0xff]   ;;  %v2994_v59 = vld [vmem:[%s3781_s1 + $0xc0] sm:$0xff]  }
  0x51   :  { %947 = vmatprep.mubr.bf16.mxu0 %v3112_v2  ;;  %v2995_v60 = vld [vmem:[%s3781_s1 + $0xc8] sm:$0xff]   ;;  %v2996_v61 = vld [vmem:[%s3781_s1 + $0xd0] sm:$0xff]   ;;  %v2997_v5 = vld [vmem:[%s3781_s1 + $0xd8] sm:$0xff]  }
  0x52   :  { %2844 = vmatmul.mubr.msk.bf16.gmra.mrb[28].mxu1 %vm725_vm1, %v2977_v4  ;;  %434 = vperm.xlu1 %2966, %v173_v6  }
  0x53   :  { %429 = vperm.xlu0 %2965, %v172_v7   ;;  %1300 = vmatprep.mubr.bf16.mxu1 %v3112_v2 }
  0x56   :  { %444 = vperm.xlu1 %2966, %v175_v8  }
  0x57   :  { %439 = vperm.xlu0 %2965, %v174_v10  }
  0x58   :  { %2812 = vmatmul.mubr.msk.bf16.gmra.mrb[32].mxu0 %vm725_vm1, %v2978_v9 }
  0x59   :  { %957 = vmatprep.mubr.bf16.mxu0 %v3112_v2 }
  0x5a   :  { %2845 = vmatmul.mubr.msk.bf16.gmra.mrb[32].mxu1 %vm725_vm1, %v2978_v9  ;;  %454 = vperm.xlu1 %2966, %v177_v12  }
  0x5b   :  { %449 = vperm.xlu0 %2965, %v176_v13   ;;  %1310 = vmatprep.mubr.bf16.mxu1 %v3112_v2 }
  0x5e   :  { %464 = vperm.xlu1 %2966, %v179_v14  }
  0x5f   :  { %459 = vperm.xlu0 %2965, %v178_v16  }
  0x60   :  { %2813 = vmatmul.mubr.msk.bf16.gmra.mrb[36].mxu0 %vm725_vm1, %v2979_v15 }
  0x61   :  { %967 = vmatprep.mubr.bf16.mxu0 %v3112_v2 }
  0x62   :  { %2846 = vmatmul.mubr.msk.bf16.gmra.mrb[36].mxu1 %vm725_vm1, %v2979_v15  ;;  %474 = vperm.xlu1 %2966, %v181_v18  }
  0x63   :  { %469 = vperm.xlu0 %2965, %v180_v19   ;;  %1320 = vmatprep.mubr.bf16.mxu1 %v3112_v2 }
  0x66   :  { %484 = vperm.xlu1 %2966, %v183_v20  }
  0x67   :  { %479 = vperm.xlu0 %2965, %v182_v22  }
  0x68   :  { %2814 = vmatmul.mubr.msk.bf16.gmra.mrb[40].mxu0 %vm725_vm1, %v2980_v21 }
  0x69   :  { %977 = vmatprep.mubr.bf16.mxu0 %v3112_v2 }
  0x6a   :  { %2847 = vmatmul.mubr.msk.bf16.gmra.mrb[40].mxu1 %vm725_vm1, %v2980_v21  ;;  %494 = vperm.xlu1 %2966, %v185_v23  }
  0x6b   :  { %489 = vperm.xlu0 %2965, %v184_v24   ;;  %1330 = vmatprep.mubr.bf16.mxu1 %v3112_v2 }
  0x6e   :  { %504 = vperm.xlu1 %2966, %v187_v25  }
  0x6f   :  { %499 = vperm.xlu0 %2965, %v186_v27  }
  0x70   :  { %2815 = vmatmul.mubr.msk.bf16.gmra.mrb[44].mxu0 %vm725_vm1, %v2981_v26 }
  0x71   :  { %987 = vmatprep.mubr.bf16.mxu0 %v3112_v2 }
  0x72   :  { %2848 = vmatmul.mubr.msk.bf16.gmra.mrb[44].mxu1 %vm725_vm1, %v2981_v26  ;;  %514 = vperm.xlu1 %2966, %v189_v28  }
  0x73   :  { %509 = vperm.xlu0 %2965, %v188_v29   ;;  %1340 = vmatprep.mubr.bf16.mxu1 %v3112_v2 }
  0x76   :  { %524 = vperm.xlu1 %2966, %v191_v30  }
  0x77   :  { %519 = vperm.xlu0 %2965, %v190_v32  }
  0x78   :  { %2816 = vmatmul.mubr.msk.bf16.gmra.mrb[48].mxu0 %vm725_vm1, %v2982_v31 }
  0x79   :  { %997 = vmatprep.mubr.bf16.mxu0 %v3112_v2 }
  0x7a   :  { %2849 = vmatmul.mubr.msk.bf16.gmra.mrb[48].mxu1 %vm725_vm1, %v2982_v31  ;;  %534 = vperm.xlu1 %2966, %v193_v33  }
  0x7b   :  { %529 = vperm.xlu0 %2965, %v192_v34   ;;  %1350 = vmatprep.mubr.bf16.mxu1 %v3112_v2 }
  0x7e   :  { %544 = vperm.xlu1 %2966, %v195_v35  }
  0x7f   :  { %539 = vperm.xlu0 %2965, %v194_v37  }
  0x80   :  { %2817 = vmatmul.mubr.msk.bf16.gmra.mrb[52].mxu0 %vm725_vm1, %v2983_v36 }
  0x81   :  { %1007 = vmatprep.mubr.bf16.mxu0 %v3112_v2  ;;  %v230_v62 = vpop.permute.xlu0 %229  ;;  %v240_v63 = vpop.permute.xlu1 %239 }
  0x82   :  { %2850 = vmatmul.mubr.msk.bf16.gmra.mrb[52].mxu1 %vm725_vm1, %v2983_v36  ;;  %1932 = vperm.xlu1 %2966, %v213_v38   ;;  %v2998_v36 = vld [vmem:[%s3781_s1 + $0xe0] sm:$0xff]  }
  0x83   :  { %1927 = vperm.xlu0 %2965, %v212_v39   ;;  %1360 = vmatprep.mubr.bf16.mxu1 %v3112_v2 }
  0x85   :  { %v235_v1 = vpop.permute.xlu0 %234  ;;  %v245_v32 = vpop.permute.xlu1 %244 }
  0x86   :  { %1942 = vperm.xlu1 %2966, %v215_v40  }
  0x87   :  { %1937 = vperm.xlu0 %2965, %v214_v42  }
  0x88   :  { %2818 = vmatmul.mubr.msk.bf16.gmra.mrb[56].mxu0 %vm725_vm1, %v2984_v41 }
  0x89   :  { %1017 = vmatprep.mubr.bf16.mxu0 %v3112_v2 }
  0x8a   :  { %2851 = vmatmul.mubr.msk.bf16.gmra.mrb[56].mxu1 %vm725_vm1, %v2984_v41  ;;  %1952 = vperm.xlu1 %2966, %v217_v43  }
  0x8b   :  { %1947 = vperm.xlu0 %2965, %v216_v44   ;;  %1370 = vmatprep.mubr.bf16.mxu1 %v3112_v2 }
  0x8e   :  { %1962 = vperm.xlu1 %2966, %v219_v45  }
  0x8f   :  { %1957 = vperm.xlu0 %2965, %v218_v47  }
  0x90   :  { %2819 = vmatmul.mubr.msk.bf16.gmra.mrb[60].mxu0 %vm725_vm1, %v2985_v46 }
  0x91   :  { %1027 = vmatprep.mubr.bf16.mxu0 %v3112_v2 }
  0x92   :  { %2852 = vmatmul.mubr.msk.bf16.gmra.mrb[60].mxu1 %vm725_vm1, %v2985_v46  ;;  %2387 = vperm.xlu1 %2966, %v223_v48  }
  0x93   :  { %2397 = vperm.xlu0 %2965, %v225_v49   ;;  %1380 = vmatprep.mubr.bf16.mxu1 %v3112_v2 }
  0x97   :  { %2392 = vperm.xlu0 %2965, %v224_v51  }
  0x98   :  { %2820 = vmatmul.mubr.msk.bf16.gmra.mrb[64].mxu0 %vm725_vm1, %v2986_v50 }
  0x99   :  { %1037 = vmatprep.mubr.bf16.mxu0 %v3112_v2 }
  0x9a   :  { %2853 = vmatmul.mubr.msk.bf16.gmra.mrb[64].mxu1 %vm725_vm1, %v2986_v50 }
  0x9b   :  { %1390 = vmatprep.mubr.bf16.mxu1 %v3112_v2 }
  0xa0   :  { %2821 = vmatmul.mubr.msk.bf16.gmra.mrb[68].mxu0 %vm725_vm1, %v2987_v52 }
  0xa1   :  { %1047 = vmatprep.mubr.bf16.mxu0 %v3112_v2 }
  0xa2   :  { %2854 = vmatmul.mubr.msk.bf16.gmra.mrb[68].mxu1 %vm725_vm1, %v2987_v52 }
  0xa3   :  { %1400 = vmatprep.mubr.bf16.mxu1 %v3112_v2 }
  0xa8   :  { %2822 = vmatmul.mubr.msk.bf16.gmra.mrb[72].mxu0 %vm725_vm1, %v2988_v53 }
  0xa9   :  { %1057 = vmatprep.mubr.bf16.mxu0 %v3112_v2 }
  0xaa   :  { %2855 = vmatmul.mubr.msk.bf16.gmra.mrb[72].mxu1 %vm725_vm1, %v2988_v53 }
  0xab   :  { %1410 = vmatprep.mubr.bf16.mxu1 %v3112_v2 }
  0xb0   :  { %2823 = vmatmul.mubr.msk.bf16.gmra.mrb[76].mxu0 %vm725_vm1, %v2989_v54 }
  0xb1   :  { %1067 = vmatprep.mubr.bf16.mxu0 %v3112_v2 }
  0xb2   :  { %2856 = vmatmul.mubr.msk.bf16.gmra.mrb[76].mxu1 %vm725_vm1, %v2989_v54 }
  0xb3   :  { %1420 = vmatprep.mubr.bf16.mxu1 %v3112_v2 }
  0xb8   :  { %2824 = vmatmul.mubr.msk.bf16.gmra.mrb[80].mxu0 %vm725_vm1, %v2990_v55 }
  0xb9   :  { %1077 = vmatprep.mubr.bf16.mxu0 %v3112_v2 }
  0xba   :  { %2857 = vmatmul.mubr.msk.bf16.gmra.mrb[80].mxu1 %vm725_vm1, %v2990_v55 }
  0xbb   :  { %1430 = vmatprep.mubr.bf16.mxu1 %v3112_v2 }
  0xc0   :  { %2825 = vmatmul.mubr.msk.bf16.gmra.mrb[84].mxu0 %vm725_vm1, %v2991_v56 }
  0xc1   :  { %1087 = vmatprep.mubr.bf16.mxu0 %v3112_v2 }
  0xc2   :  { %2858 = vmatmul.mubr.msk.bf16.gmra.mrb[84].mxu1 %vm725_vm1, %v2991_v56 }
  0xc3   :  { %1440 = vmatprep.mubr.bf16.mxu1 %v3112_v2 }
  0xc8   :  { %2826 = vmatmul.mubr.msk.bf16.gmra.mrb[88].mxu0 %vm725_vm1, %v2992_v57 }
  0xc9   :  { %1097 = vmatprep.mubr.bf16.mxu0 %v3112_v2 }
  0xca   :  { %2859 = vmatmul.mubr.msk.bf16.gmra.mrb[88].mxu1 %vm725_vm1, %v2992_v57 }
  0xcb   :  { %1450 = vmatprep.mubr.bf16.mxu1 %v3112_v2 }
  0xd0   :  { %2827 = vmatmul.mubr.msk.bf16.gmra.mrb[92].mxu0 %vm725_vm1, %v2993_v58 }
  0xd1   :  { %1107 = vmatprep.mubr.bf16.mxu0 %v3112_v2 }
  0xd2   :  { %2860 = vmatmul.mubr.msk.bf16.gmra.mrb[92].mxu1 %vm725_vm1, %v2993_v58  ;;  %v250_v58 = vpop.permute.xlu0 %249 }
  0xd3   :  { %1460 = vmatprep.mubr.bf16.mxu1 %v3112_v2 }
  0xd8   :  { %2828 = vmatmul.mubr.msk.bf16.gmra.mrb[96].mxu0 %vm725_vm1, %v2994_v59 }
  0xd9   :  { %1117 = vmatprep.mubr.bf16.mxu0 %v3112_v2 }
  0xda   :  { %2861 = vmatmul.mubr.msk.bf16.gmra.mrb[96].mxu1 %vm725_vm1, %v2994_v59 }
  0xdb   :  { %1470 = vmatprep.mubr.bf16.mxu1 %v3112_v2 }
  0xe0   :  { %2829 = vmatmul.mubr.msk.bf16.gmra.mrb[100].mxu0 %vm725_vm1, %v2995_v60 }
  0xe1   :  { %1127 = vmatprep.mubr.bf16.mxu0 %v3112_v2 }
  0xe2   :  { %2862 = vmatmul.mubr.msk.bf16.gmra.mrb[100].mxu1 %vm725_vm1, %v2995_v60 }
  0xe3   :  { %1480 = vmatprep.mubr.bf16.mxu1 %v3112_v2 }
  0xe8   :  { %2830 = vmatmul.mubr.msk.bf16.gmra.mrb[104].mxu0 %vm725_vm1, %v2996_v61 }
  0xe9   :  { %1137 = vmatprep.mubr.bf16.mxu0 %v3112_v2 }
  0xea   :  { %2863 = vmatmul.mubr.msk.bf16.gmra.mrb[104].mxu1 %vm725_vm1, %v2996_v61 }
  0xeb   :  { %v869_v0 = vpop.f32.mrb[0].mxu0  ;;  %1490 = vmatprep.mubr.bf16.mxu1 %v3112_v2 }
  0xec   :  { %v870_v3 = vadd.f32 %v869_v0, %v230_v62  ;;  %v871_v4 = vpop.f32.mrb[1].mxu0 }
  0xed   :  { %v872_v6 = vadd.f32 %v871_v4, %v230_v62  ;;  %v873_v7 = vpop.f32.mrb[2].mxu0  ;;  %v1222_v8 = vpop.f32.mrb[0].mxu1  ;;  %v2999_v4 = vld [vmem:[%s3781_s1 + $0xe8] sm:$0xff]  }
  0xee   :  { %v1541_v9 = vmax.f32 %v870_v3, 0.0  ;;  %v874_v10 = vadd.f32 %v873_v7, %v235_v1  ;;  %v1223_v12 = vadd.f32 %v1222_v8, %v230_v62  ;;  %v875_v13 = vpop.f32.mrb[3].mxu0  ;;  %v1224_v14 = vpop.f32.mrb[1].mxu1 }
  0xef   :  { %v1542_v15 = vmax.f32 %v872_v6, 0.0  ;;  %v876_v16 = vadd.f32 %v875_v13, %v235_v1  ;;  %v1225_v18 = vadd.f32 %v1224_v14, %v230_v62  ;;  %v1226_v19 = vpop.f32.mrb[2].mxu1 }
  0xf0   :  { %v1545_v20 = vmax.f32 %v874_v10, 0.0  ;;  %v1227_v21 = vadd.f32 %v1226_v19, %v235_v1  ;;  %2831 = vmatmul.mubr.msk.bf16.gmra.mrb[108].mxu0 %vm725_vm1, %v2997_v5  ;;  %v1228_v22 = vpop.f32.mrb[3].mxu1  ;;  %v1543_v26 = vmax.f32 %v1223_v12, 0.0 }
  0xf1   :  { %v1546_v23 = vmax.f32 %v876_v16, 0.0  ;;  %v1229_v24 = vadd.f32 %v1228_v22, %v235_v1  ;;  %1147 = vmatprep.mubr.bf16.mxu0 %v3112_v2  ;;  %v1544_v29 = vmax.f32 %v1225_v18, 0.0 }
  0xf2   :  { %v1797_v25 = vpack.c.bf16 %v1545_v20, %v1541_v9  ;;  %v1547_v27 = vmax.f32 %v1227_v21, 0.0  ;;  %2864 = vmatmul.mubr.msk.bf16.gmra.mrb[108].mxu1 %vm725_vm1, %v2997_v5 }
  0xf3   :  { %v1798_v28 = vpack.c.bf16 %v1546_v23, %v1542_v15  ;;  %v1548_v30 = vmax.f32 %v1229_v24, 0.0  ;;  %v879_v31 = vpop.f32.mrb[4].mxu0  ;;  %1500 = vmatprep.mubr.bf16.mxu1 %v3112_v2 }
  0xf4   :  { %v1799_v33 = vpack.c.bf16 %v1547_v27, %v1543_v26  ;;  %v880_v34 = vadd.f32 %v879_v31, %v240_v63  ;;  %v881_v35 = vpop.f32.mrb[5].mxu0 }
  0xf5   :  { %v1800_v37 = vpack.c.bf16 %v1548_v30, %v1544_v29  ;;  %2045 = vmatprep.subr.bf16.mxu0 %v1798_v28  ;;  %v882_v38 = vadd.f32 %v881_v35, %v240_v63  ;;  %v1232_v39 = vpop.f32.mrb[4].mxu1  ;;  %v883_v40 = vpop.f32.mrb[6].mxu0 }
  0xf6   :  { %2046 = vmatpush1.bf16.msra.mxu0 %v1797_v25  ;;  %v1549_v41 = vmax.f32 %v880_v34, 0.0  ;;  %v1233_v42 = vadd.f32 %v1232_v39, %v240_v63  ;;  %v884_v43 = vadd.f32 %v883_v40, %v245_v32  ;;  %v1234_v44 = vpop.f32.mrb[5].mxu1  ;;  %v885_v45 = vpop.f32.mrb[7].mxu0 }
  0xf7   :  { %2191 = vmatprep.subr.bf16.mxu1 %v1800_v37  ;;  %v1550_v46 = vmax.f32 %v882_v38, 0.0  ;;  %v1235_v47 = vadd.f32 %v1234_v44, %v240_v63  ;;  %v886_v48 = vadd.f32 %v885_v45, %v245_v32  ;;  %v1236_v49 = vpop.f32.mrb[6].mxu1  ;;  %v255_v63 = vpop.permute.xlu1 %254  ;;  %v3000_v37 = vld [vmem:[%s3781_s1 + $0xf0] sm:$0xff]  }
  0xf8   :  { %2832 = vmatmul.mubr.msk.bf16.gmra.mrb[112].mxu0 %vm725_vm1, %v2998_v36  ;;  %2192 = vmatpush1.bf16.msra.mxu1 %v1799_v33  ;;  %v1553_v50 = vmax.f32 %v884_v43, 0.0  ;;  %v1237_v51 = vadd.f32 %v1236_v49, %v245_v32  ;;  %v1238_v52 = vpop.f32.mrb[7].mxu1  ;;  %v1551_v55 = vmax.f32 %v1233_v42, 0.0  ;;  %v260_v28 = vpop.permute.xlu0 %259 }
  0xf9   :  { %v1554_v53 = vmax.f32 %v886_v48, 0.0  ;;  %v1239_v54 = vadd.f32 %v1238_v52, %v245_v32  ;;  %1157 = vmatprep.mubr.bf16.mxu0 %v3112_v2  ;;  %v1552_v59 = vmax.f32 %v1235_v47, 0.0 }
  0xfa   :  { %v1801_v56 = vpack.c.bf16 %v1553_v50, %v1549_v41  ;;  %v1555_v57 = vmax.f32 %v1237_v51, 0.0  ;;  %2865 = vmatmul.mubr.msk.bf16.gmra.mrb[112].mxu1 %vm725_vm1, %v2998_v36 }
  0xfb   :  { %v1802_v60 = vpack.c.bf16 %v1554_v53, %v1550_v46  ;;  %v889_v61 = vpop.f32.mrb[8].mxu0  ;;  %v1556_v62 = vmax.f32 %v1239_v54, 0.0  ;;  %1510 = vmatprep.mubr.bf16.mxu1 %v3112_v2  ;;  %v265_v33 = vpop.permute.xlu1 %264 }
  0xfc   :  { %v1803_v0 = vpack.c.bf16 %v1555_v57, %v1551_v55  ;;  %v890_v1 = vadd.f32 %v889_v61, %v250_v58  ;;  %v891_v3 = vpop.f32.mrb[9].mxu0 }
  0xfd   :  { %v1804_v5 = vpack.c.bf16 %v1556_v62, %v1552_v59  ;;  %v892_v6 = vadd.f32 %v891_v3, %v250_v58  ;;  %v893_v7 = vpop.f32.mrb[10].mxu0  ;;  %v1242_v8 = vpop.f32.mrb[8].mxu1  ;;  %2047 = vmatprep.subr.bf16.mxu0 %v1802_v60 }
  0xfe   :  { %v1557_v9 = vmax.f32 %v890_v1, 0.0  ;;  %v894_v10 = vadd.f32 %v893_v7, %v255_v63  ;;  %v1243_v12 = vadd.f32 %v1242_v8, %v250_v58  ;;  %v895_v13 = vpop.f32.mrb[11].mxu0  ;;  %v1244_v14 = vpop.f32.mrb[9].mxu1  ;;  %2048 = vmatpush1.bf16.msra.mxu0 %v1801_v56 }
  0xff   :  { %v1558_v15 = vmax.f32 %v892_v6, 0.0  ;;  %v896_v16 = vadd.f32 %v895_v13, %v255_v63  ;;  %v1245_v18 = vadd.f32 %v1244_v14, %v250_v58  ;;  %v1246_v19 = vpop.f32.mrb[10].mxu1  ;;  %2193 = vmatprep.subr.bf16.mxu1 %v1804_v5  ;;  %v270_v59 = vpop.permute.xlu0 %269  ;;  %v3001_v5 = vld [vmem:[%s3781_s1 + $0xf8] sm:$0xff]  }
 0x100   :  { %v1561_v20 = vmax.f32 %v894_v10, 0.0  ;;  %v1247_v21 = vadd.f32 %v1246_v19, %v255_v63  ;;  %2833 = vmatmul.mubr.msk.bf16.gmra.mrb[116].mxu0 %vm725_vm1, %v2999_v4  ;;  %v1248_v22 = vpop.f32.mrb[11].mxu1  ;;  %2194 = vmatpush1.bf16.msra.mxu1 %v1803_v0  ;;  %v1559_v26 = vmax.f32 %v1243_v12, 0.0  ;;  %v275_v0 = vpop.permute.xlu1 %274  ;;  %v3004_v10 = vld [vmem:[%s3783_s3 + $0x4] ss:$16 sps:$4 sm:$0xff]  }
 0x101   :  { %v1562_v23 = vmax.f32 %v896_v16, 0.0  ;;  %v1249_v24 = vadd.f32 %v1248_v22, %v255_v63  ;;  %1167 = vmatprep.mubr.bf16.mxu0 %v3112_v2  ;;  %v1560_v30 = vmax.f32 %v1245_v18, 0.0 }
 0x102   :  { %v1805_v25 = vpack.c.bf16 %v1561_v20, %v1557_v9  ;;  %v1563_v27 = vmax.f32 %v1247_v21, 0.0  ;;  %2866 = vmatmul.mubr.msk.bf16.gmra.mrb[116].mxu1 %vm725_vm1, %v2999_v4 }
 0x103   :  { %v1806_v29 = vpack.c.bf16 %v1562_v23, %v1558_v15  ;;  %v1564_v31 = vmax.f32 %v1249_v24, 0.0  ;;  %v899_v32 = vpop.f32.mrb[12].mxu0  ;;  %1520 = vmatprep.mubr.bf16.mxu1 %v3112_v2 }
 0x104   :  { %v1807_v34 = vpack.c.bf16 %v1563_v27, %v1559_v26  ;;  %v900_v35 = vadd.f32 %v899_v32, %v260_v28  ;;  %v901_v36 = vpop.f32.mrb[13].mxu0 }
 0x105   :  { %v1808_v38 = vpack.c.bf16 %v1564_v31, %v1560_v30  ;;  %v902_v39 = vadd.f32 %v901_v36, %v260_v28  ;;  %v903_v40 = vpop.f32.mrb[14].mxu0  ;;  %v1252_v41 = vpop.f32.mrb[12].mxu1  ;;  %2049 = vmatprep.subr.bf16.mxu0 %v1806_v29 }
 0x106   :  { %v1565_v42 = vmax.f32 %v900_v35, 0.0  ;;  %v904_v43 = vadd.f32 %v903_v40, %v265_v33  ;;  %v1253_v44 = vadd.f32 %v1252_v41, %v260_v28  ;;  %v905_v45 = vpop.f32.mrb[15].mxu0  ;;  %v1254_v46 = vpop.f32.mrb[13].mxu1  ;;  %2050 = vmatpush1.bf16.msra.mxu0 %v1805_v25 }
 0x107   :  { %v1566_v47 = vmax.f32 %v902_v39, 0.0  ;;  %v906_v48 = vadd.f32 %v905_v45, %v265_v33  ;;  %v1255_v49 = vadd.f32 %v1254_v46, %v260_v28  ;;  %v1256_v50 = vpop.f32.mrb[14].mxu1  ;;  %2195 = vmatprep.subr.bf16.mxu1 %v1808_v38  ;;  %v280_v30 = vpop.permute.xlu0 %279 }
 0x108   :  { %v1569_v51 = vmax.f32 %v904_v43, 0.0  ;;  %v1257_v52 = vadd.f32 %v1256_v50, %v265_v33  ;;  %2834 = vmatmul.mubr.msk.bf16.gmra.mrb[120].mxu0 %vm725_vm1, %v3000_v37  ;;  %v1258_v53 = vpop.f32.mrb[15].mxu1  ;;  %2196 = vmatpush1.bf16.msra.mxu1 %v1807_v34  ;;  %v1567_v57 = vmax.f32 %v1253_v44, 0.0  ;;  %v285_v35 = vpop.permute.xlu1 %284 }
 0x109   :  { %v1570_v54 = vmax.f32 %v906_v48, 0.0  ;;  %v1259_v55 = vadd.f32 %v1258_v53, %v265_v33  ;;  %1177 = vmatprep.mubr.bf16.mxu0 %v3112_v2  ;;  %v1568_v61 = vmax.f32 %v1255_v49, 0.0 }
 0x10a   :  { %v1809_v56 = vpack.c.bf16 %v1569_v51, %v1565_v42  ;;  %v1571_v58 = vmax.f32 %v1257_v52, 0.0  ;;  %2867 = vmatmul.mubr.msk.bf16.gmra.mrb[120].mxu1 %vm725_vm1, %v3000_v37 }
 0x10b   :  { %v1810_v60 = vpack.c.bf16 %v1570_v54, %v1566_v47  ;;  %v1572_v62 = vmax.f32 %v1259_v55, 0.0  ;;  %v909_v63 = vpop.f32.mrb[16].mxu0  ;;  %1530 = vmatprep.mubr.bf16.mxu1 %v3112_v2 }
 0x10c   :  { %v1811_v1 = vpack.c.bf16 %v1571_v58, %v1567_v57  ;;  %v910_v3 = vadd.f32 %v909_v63, %v270_v59  ;;  %v911_v4 = vpop.f32.mrb[17].mxu0 }
 0x10d   :  { %v1812_v6 = vpack.c.bf16 %v1572_v62, %v1568_v61  ;;  %v912_v7 = vadd.f32 %v911_v4, %v270_v59  ;;  %v913_v8 = vpop.f32.mrb[18].mxu0  ;;  %v1262_v9 = vpop.f32.mrb[16].mxu1  ;;  %2051 = vmatprep.subr.bf16.mxu0 %v1810_v60 }
 0x10e   :  { %v1573_v12 = vmax.f32 %v910_v3, 0.0  ;;  %v914_v13 = vadd.f32 %v913_v8, %v275_v0  ;;  %v1263_v14 = vadd.f32 %v1262_v9, %v270_v59  ;;  %v915_v15 = vpop.f32.mrb[19].mxu0  ;;  %v1264_v16 = vpop.f32.mrb[17].mxu1  ;;  %2052 = vmatpush1.bf16.msra.mxu0 %v1809_v56 }
 0x10f   :  { %v1574_v18 = vmax.f32 %v912_v7, 0.0  ;;  %v916_v19 = vadd.f32 %v915_v15, %v275_v0  ;;  %v1265_v20 = vadd.f32 %v1264_v16, %v270_v59  ;;  %v1266_v21 = vpop.f32.mrb[18].mxu1  ;;  %2197 = vmatprep.subr.bf16.mxu1 %v1812_v6  ;;  %v290_v60 = vpop.permute.xlu0 %289 }
 0x110   :  { %v1577_v22 = vmax.f32 %v914_v13, 0.0  ;;  %v1267_v23 = vadd.f32 %v1266_v21, %v275_v0  ;;  %2835 = vmatmul.mubr.msk.bf16.gmra.mrb[124].mxu0 %vm725_vm1, %v3001_v5  ;;  %v1268_v24 = vpop.f32.mrb[19].mxu1  ;;  %2198 = vmatpush1.bf16.msra.mxu1 %v1811_v1  ;;  %v1575_v28 = vmax.f32 %v1263_v14, 0.0  ;;  %v295_v1 = vpop.permute.xlu1 %294 }
 0x111   :  { %v1578_v25 = vmax.f32 %v916_v19, 0.0  ;;  %v1269_v26 = vadd.f32 %v1268_v24, %v275_v0  ;;  %2077 = vmatprep.mubr.bf16.mxu0 %v3004_v10  ;;  %v1576_v32 = vmax.f32 %v1265_v20, 0.0 }
 0x112   :  { %v1813_v27 = vpack.c.bf16 %v1577_v22, %v1573_v12  ;;  %v1579_v29 = vmax.f32 %v1267_v23, 0.0  ;;  %2868 = vmatmul.mubr.msk.bf16.gmra.mrb[124].mxu1 %vm725_vm1, %v3001_v5 }
 0x113   :  { %v1814_v31 = vpack.c.bf16 %v1578_v25, %v1574_v18  ;;  %v1580_v33 = vmax.f32 %v1269_v26, 0.0  ;;  %v919_v34 = vpop.f32.mrb[20].mxu0  ;;  %2223 = vmatprep.mubr.bf16.mxu1 %v3004_v10 }
 0x114   :  { %v1815_v36 = vpack.c.bf16 %v1579_v29, %v1575_v28  ;;  %v920_v37 = vadd.f32 %v919_v34, %v280_v30  ;;  %v921_v38 = vpop.f32.mrb[21].mxu0  ;;  %v300_v29 = vpop.permute.xlu0 %299 }
 0x115   :  { %v1816_v39 = vpack.c.bf16 %v1580_v33, %v1576_v32  ;;  %v922_v40 = vadd.f32 %v921_v38, %v280_v30  ;;  %v923_v41 = vpop.f32.mrb[22].mxu0  ;;  %v1272_v42 = vpop.f32.mrb[20].mxu1  ;;  %2053 = vmatprep.subr.bf16.mxu0 %v1814_v31 }
 0x116   :  { %v1581_v43 = vmax.f32 %v920_v37, 0.0  ;;  %v924_v44 = vadd.f32 %v923_v41, %v285_v35  ;;  %v1273_v45 = vadd.f32 %v1272_v42, %v280_v30  ;;  %v925_v46 = vpop.f32.mrb[23].mxu0  ;;  %v1274_v47 = vpop.f32.mrb[21].mxu1  ;;  %2054 = vmatpush1.bf16.msra.mxu0 %v1813_v27 }
 0x117   :  { %v1582_v48 = vmax.f32 %v922_v40, 0.0  ;;  %v926_v49 = vadd.f32 %v925_v46, %v285_v35  ;;  %v1275_v50 = vadd.f32 %v1274_v47, %v280_v30  ;;  %v1276_v51 = vpop.f32.mrb[22].mxu1  ;;  %2199 = vmatprep.subr.bf16.mxu1 %v1816_v39  ;;  %v305_v34 = vpop.permute.xlu1 %304 }
 0x118   :  { %v1585_v52 = vmax.f32 %v924_v44, 0.0  ;;  %v1277_v53 = vadd.f32 %v1276_v51, %v285_v35  ;;  %v1278_v54 = vpop.f32.mrb[23].mxu1  ;;  %2200 = vmatpush1.bf16.msra.mxu1 %v1815_v36  ;;  %v1583_v58 = vmax.f32 %v1273_v45, 0.0 }
 0x119   :  { %v1586_v55 = vmax.f32 %v926_v49, 0.0  ;;  %v1279_v56 = vadd.f32 %v1278_v54, %v285_v35  ;;  %v1584_v62 = vmax.f32 %v1275_v50, 0.0 }
 0x11a   :  { %v1817_v57 = vpack.c.bf16 %v1585_v52, %v1581_v43  ;;  %v1587_v59 = vmax.f32 %v1277_v53, 0.0 }
 0x11b   :  { %v1818_v61 = vpack.c.bf16 %v1586_v55, %v1582_v48  ;;  %v1588_v63 = vmax.f32 %v1279_v56, 0.0  ;;  %v929_v0 = vpop.f32.mrb[24].mxu0 }
 0x11c   :  { %v1819_v3 = vpack.c.bf16 %v1587_v59, %v1583_v58  ;;  %v930_v4 = vadd.f32 %v929_v0, %v290_v60  ;;  %v931_v5 = vpop.f32.mrb[25].mxu0  ;;  %v310_v59 = vpop.permute.xlu0 %309 }
 0x11d   :  { %v1820_v6 = vpack.c.bf16 %v1588_v63, %v1584_v62  ;;  %v932_v7 = vadd.f32 %v931_v5, %v290_v60  ;;  %v933_v8 = vpop.f32.mrb[26].mxu0  ;;  %v1282_v9 = vpop.f32.mrb[24].mxu1  ;;  %2055 = vmatprep.subr.bf16.mxu0 %v1818_v61 }
 0x11e   :  { %v1589_v10 = vmax.f32 %v930_v4, 0.0  ;;  %v934_v12 = vadd.f32 %v933_v8, %v295_v1  ;;  %v1283_v13 = vadd.f32 %v1282_v9, %v290_v60  ;;  %v935_v14 = vpop.f32.mrb[27].mxu0  ;;  %v1284_v15 = vpop.f32.mrb[25].mxu1  ;;  %2056 = vmatpush1.bf16.msra.mxu0 %v1817_v57 }
 0x11f   :  { %v1590_v16 = vmax.f32 %v932_v7, 0.0  ;;  %v936_v18 = vadd.f32 %v935_v14, %v295_v1  ;;  %v1285_v19 = vadd.f32 %v1284_v15, %v290_v60  ;;  %v1286_v20 = vpop.f32.mrb[26].mxu1  ;;  %2201 = vmatprep.subr.bf16.mxu1 %v1820_v6  ;;  %v315_v0 = vpop.permute.xlu1 %314 }
 0x120   :  { %v1593_v21 = vmax.f32 %v934_v12, 0.0  ;;  %v1287_v22 = vadd.f32 %v1286_v20, %v295_v1  ;;  %v1288_v23 = vpop.f32.mrb[27].mxu1  ;;  %2202 = vmatpush1.bf16.msra.mxu1 %v1819_v3  ;;  %v1591_v27 = vmax.f32 %v1283_v13, 0.0 }
 0x121   :  { %v1594_v24 = vmax.f32 %v936_v18, 0.0  ;;  %v1289_v25 = vadd.f32 %v1288_v23, %v295_v1  ;;  %v1592_v31 = vmax.f32 %v1285_v19, 0.0 }
 0x122   :  { %v1821_v26 = vpack.c.bf16 %v1593_v21, %v1589_v10  ;;  %v1595_v28 = vmax.f32 %v1287_v22, 0.0 }
 0x123   :  { %v1822_v30 = vpack.c.bf16 %v1594_v24, %v1590_v16  ;;  %v1596_v32 = vmax.f32 %v1289_v25, 0.0  ;;  %v939_v33 = vpop.f32.mrb[28].mxu0 }
 0x124   :  { %v1823_v35 = vpack.c.bf16 %v1595_v28, %v1591_v27  ;;  %v940_v36 = vadd.f32 %v939_v33, %v300_v29  ;;  %v941_v37 = vpop.f32.mrb[29].mxu0  ;;  %v320_v28 = vpop.permute.xlu0 %319 }
 0x125   :  { %v1824_v38 = vpack.c.bf16 %v1596_v32, %v1592_v31  ;;  %v942_v39 = vadd.f32 %v941_v37, %v300_v29  ;;  %v943_v40 = vpop.f32.mrb[30].mxu0  ;;  %v1292_v41 = vpop.f32.mrb[28].mxu1  ;;  %2057 = vmatprep.subr.bf16.mxu0 %v1822_v30 }
 0x126   :  { %v1597_v42 = vmax.f32 %v940_v36, 0.0  ;;  %v944_v43 = vadd.f32 %v943_v40, %v305_v34  ;;  %v1293_v44 = vadd.f32 %v1292_v41, %v300_v29  ;;  %v945_v45 = vpop.f32.mrb[31].mxu0  ;;  %v1294_v46 = vpop.f32.mrb[29].mxu1  ;;  %2058 = vmatpush1.bf16.msra.mxu0 %v1821_v26 }
 0x127   :  { %v1598_v47 = vmax.f32 %v942_v39, 0.0  ;;  %v946_v48 = vadd.f32 %v945_v45, %v305_v34  ;;  %v1295_v49 = vadd.f32 %v1294_v46, %v300_v29  ;;  %v1296_v50 = vpop.f32.mrb[30].mxu1  ;;  %2203 = vmatprep.subr.bf16.mxu1 %v1824_v38  ;;  %v325_v33 = vpop.permute.xlu1 %324 }
 0x128   :  { %v1601_v51 = vmax.f32 %v944_v43, 0.0  ;;  %v1297_v52 = vadd.f32 %v1296_v50, %v305_v34  ;;  %v1298_v53 = vpop.f32.mrb[31].mxu1  ;;  %2204 = vmatpush1.bf16.msra.mxu1 %v1823_v35  ;;  %v1599_v57 = vmax.f32 %v1293_v44, 0.0 }
 0x129   :  { %v1602_v54 = vmax.f32 %v946_v48, 0.0  ;;  %v1299_v55 = vadd.f32 %v1298_v53, %v305_v34  ;;  %v1600_v61 = vmax.f32 %v1295_v49, 0.0 }
 0x12a   :  { %v1825_v56 = vpack.c.bf16 %v1601_v51, %v1597_v42  ;;  %v1603_v58 = vmax.f32 %v1297_v52, 0.0 }
 0x12b   :  { %v1826_v60 = vpack.c.bf16 %v1602_v54, %v1598_v47  ;;  %v1604_v62 = vmax.f32 %v1299_v55, 0.0  ;;  %v949_v63 = vpop.f32.mrb[32].mxu0 }
 0x12c   :  { %v1827_v1 = vpack.c.bf16 %v1603_v58, %v1599_v57  ;;  %v950_v3 = vadd.f32 %v949_v63, %v310_v59  ;;  %v951_v4 = vpop.f32.mrb[33].mxu0  ;;  %v330_v58 = vpop.permute.xlu0 %329 }
 0x12d   :  { %v1828_v5 = vpack.c.bf16 %v1604_v62, %v1600_v61  ;;  %v952_v6 = vadd.f32 %v951_v4, %v310_v59  ;;  %v953_v7 = vpop.f32.mrb[34].mxu0  ;;  %v1302_v8 = vpop.f32.mrb[32].mxu1  ;;  %2059 = vmatprep.subr.bf16.mxu0 %v1826_v60 }
 0x12e   :  { %v1605_v9 = vmax.f32 %v950_v3, 0.0  ;;  %v954_v10 = vadd.f32 %v953_v7, %v315_v0  ;;  %v1303_v12 = vadd.f32 %v1302_v8, %v310_v59  ;;  %v955_v13 = vpop.f32.mrb[35].mxu0  ;;  %v1304_v14 = vpop.f32.mrb[33].mxu1  ;;  %2060 = vmatpush1.bf16.msra.mxu0 %v1825_v56 }
 0x12f   :  { %v1606_v15 = vmax.f32 %v952_v6, 0.0  ;;  %v956_v16 = vadd.f32 %v955_v13, %v315_v0  ;;  %v1305_v18 = vadd.f32 %v1304_v14, %v310_v59  ;;  %v1306_v19 = vpop.f32.mrb[34].mxu1  ;;  %2205 = vmatprep.subr.bf16.mxu1 %v1828_v5  ;;  %v335_v63 = vpop.permute.xlu1 %334 }
 0x130   :  { %v1609_v20 = vmax.f32 %v954_v10, 0.0  ;;  %v1307_v21 = vadd.f32 %v1306_v19, %v315_v0  ;;  %v1308_v22 = vpop.f32.mrb[35].mxu1  ;;  %2206 = vmatpush1.bf16.msra.mxu1 %v1827_v1  ;;  %v1607_v26 = vmax.f32 %v1303_v12, 0.0 }
 0x131   :  { %v1610_v23 = vmax.f32 %v956_v16, 0.0  ;;  %v1309_v24 = vadd.f32 %v1308_v22, %v315_v0  ;;  %v1608_v30 = vmax.f32 %v1305_v18, 0.0 }
 0x132   :  { %v1829_v25 = vpack.c.bf16 %v1609_v20, %v1605_v9  ;;  %v1611_v27 = vmax.f32 %v1307_v21, 0.0 }
 0x133   :  { %v1830_v29 = vpack.c.bf16 %v1610_v23, %v1606_v15  ;;  %v1612_v31 = vmax.f32 %v1309_v24, 0.0  ;;  %v959_v32 = vpop.f32.mrb[36].mxu0 }
 0x134   :  { %v1831_v34 = vpack.c.bf16 %v1611_v27, %v1607_v26  ;;  %v960_v35 = vadd.f32 %v959_v32, %v320_v28  ;;  %v961_v36 = vpop.f32.mrb[37].mxu0  ;;  %v340_v27 = vpop.permute.xlu0 %339 }
 0x135   :  { %v1832_v37 = vpack.c.bf16 %v1612_v31, %v1608_v30  ;;  %v962_v38 = vadd.f32 %v961_v36, %v320_v28  ;;  %v963_v39 = vpop.f32.mrb[38].mxu0  ;;  %v1312_v40 = vpop.f32.mrb[36].mxu1  ;;  %2061 = vmatprep.subr.bf16.mxu0 %v1830_v29 }
 0x136   :  { %v1613_v41 = vmax.f32 %v960_v35, 0.0  ;;  %v964_v42 = vadd.f32 %v963_v39, %v325_v33  ;;  %v1313_v43 = vadd.f32 %v1312_v40, %v320_v28  ;;  %v965_v44 = vpop.f32.mrb[39].mxu0  ;;  %v1314_v45 = vpop.f32.mrb[37].mxu1  ;;  %2062 = vmatpush1.bf16.msra.mxu0 %v1829_v25 }
 0x137   :  { %v1614_v46 = vmax.f32 %v962_v38, 0.0  ;;  %v966_v47 = vadd.f32 %v965_v44, %v325_v33  ;;  %v1315_v48 = vadd.f32 %v1314_v45, %v320_v28  ;;  %v1316_v49 = vpop.f32.mrb[38].mxu1  ;;  %2207 = vmatprep.subr.bf16.mxu1 %v1832_v37  ;;  %v345_v32 = vpop.permute.xlu1 %344 }
 0x138   :  { %v1617_v50 = vmax.f32 %v964_v42, 0.0  ;;  %v1317_v51 = vadd.f32 %v1316_v49, %v325_v33  ;;  %v1318_v52 = vpop.f32.mrb[39].mxu1  ;;  %2208 = vmatpush1.bf16.msra.mxu1 %v1831_v34  ;;  %v1615_v56 = vmax.f32 %v1313_v43, 0.0 }
 0x139   :  { %v1618_v53 = vmax.f32 %v966_v47, 0.0  ;;  %v1319_v54 = vadd.f32 %v1318_v52, %v325_v33  ;;  %v1616_v60 = vmax.f32 %v1315_v48, 0.0 }
 0x13a   :  { %v1833_v55 = vpack.c.bf16 %v1617_v50, %v1613_v41  ;;  %v1619_v57 = vmax.f32 %v1317_v51, 0.0 }
 0x13b   :  { %v1834_v59 = vpack.c.bf16 %v1618_v53, %v1614_v46  ;;  %v1620_v61 = vmax.f32 %v1319_v54, 0.0  ;;  %v969_v62 = vpop.f32.mrb[40].mxu0 }
 0x13c   :  { %v1835_v0 = vpack.c.bf16 %v1619_v57, %v1615_v56  ;;  %v970_v1 = vadd.f32 %v969_v62, %v330_v58  ;;  %v971_v3 = vpop.f32.mrb[41].mxu0  ;;  %v350_v57 = vpop.permute.xlu0 %349 }
 0x13d   :  { %v1836_v4 = vpack.c.bf16 %v1620_v61, %v1616_v60  ;;  %v972_v5 = vadd.f32 %v971_v3, %v330_v58  ;;  %v973_v6 = vpop.f32.mrb[42].mxu0  ;;  %v1322_v7 = vpop.f32.mrb[40].mxu1  ;;  %2063 = vmatprep.subr.bf16.mxu0 %v1834_v59 }
 0x13e   :  { %v1621_v8 = vmax.f32 %v970_v1, 0.0  ;;  %v974_v9 = vadd.f32 %v973_v6, %v335_v63  ;;  %v1323_v10 = vadd.f32 %v1322_v7, %v330_v58  ;;  %v975_v12 = vpop.f32.mrb[43].mxu0  ;;  %v1324_v13 = vpop.f32.mrb[41].mxu1  ;;  %2064 = vmatpush1.bf16.msra.mxu0 %v1833_v55 }
 0x13f   :  { %v1622_v14 = vmax.f32 %v972_v5, 0.0  ;;  %v976_v15 = vadd.f32 %v975_v12, %v335_v63  ;;  %v1325_v16 = vadd.f32 %v1324_v13, %v330_v58  ;;  %v1326_v18 = vpop.f32.mrb[42].mxu1  ;;  %2209 = vmatprep.subr.bf16.mxu1 %v1836_v4  ;;  %v355_v62 = vpop.permute.xlu1 %354 }
 0x140   :  { %v1625_v19 = vmax.f32 %v974_v9, 0.0  ;;  %v1327_v20 = vadd.f32 %v1326_v18, %v335_v63  ;;  %v1328_v21 = vpop.f32.mrb[43].mxu1  ;;  %2210 = vmatpush1.bf16.msra.mxu1 %v1835_v0  ;;  %v1623_v25 = vmax.f32 %v1323_v10, 0.0 }
 0x141   :  { %v1626_v22 = vmax.f32 %v976_v15, 0.0  ;;  %v1329_v23 = vadd.f32 %v1328_v21, %v335_v63  ;;  %v1624_v29 = vmax.f32 %v1325_v16, 0.0 }
 0x142   :  { %v1837_v24 = vpack.c.bf16 %v1625_v19, %v1621_v8  ;;  %v1627_v26 = vmax.f32 %v1327_v20, 0.0 }
 0x143   :  { %v1838_v28 = vpack.c.bf16 %v1626_v22, %v1622_v14  ;;  %v1628_v30 = vmax.f32 %v1329_v23, 0.0  ;;  %v979_v31 = vpop.f32.mrb[44].mxu0 }
 0x144   :  { %v1839_v33 = vpack.c.bf16 %v1627_v26, %v1623_v25  ;;  %v980_v34 = vadd.f32 %v979_v31, %v340_v27  ;;  %v981_v35 = vpop.f32.mrb[45].mxu0  ;;  %v360_v26 = vpop.permute.xlu0 %359 }
 0x145   :  { %v1840_v36 = vpack.c.bf16 %v1628_v30, %v1624_v29  ;;  %v982_v37 = vadd.f32 %v981_v35, %v340_v27  ;;  %v983_v38 = vpop.f32.mrb[46].mxu0  ;;  %v1332_v39 = vpop.f32.mrb[44].mxu1  ;;  %2065 = vmatprep.subr.bf16.mxu0 %v1838_v28 }
 0x146   :  { %v1629_v40 = vmax.f32 %v980_v34, 0.0  ;;  %v984_v41 = vadd.f32 %v983_v38, %v345_v32  ;;  %v1333_v42 = vadd.f32 %v1332_v39, %v340_v27  ;;  %v985_v43 = vpop.f32.mrb[47].mxu0  ;;  %v1334_v44 = vpop.f32.mrb[45].mxu1  ;;  %2066 = vmatpush1.bf16.msra.mxu0 %v1837_v24 }
 0x147   :  { %v1630_v45 = vmax.f32 %v982_v37, 0.0  ;;  %v986_v46 = vadd.f32 %v985_v43, %v345_v32  ;;  %v1335_v47 = vadd.f32 %v1334_v44, %v340_v27  ;;  %v1336_v48 = vpop.f32.mrb[46].mxu1  ;;  %2211 = vmatprep.subr.bf16.mxu1 %v1840_v36  ;;  %v365_v31 = vpop.permute.xlu1 %364 }
 0x148   :  { %v1633_v49 = vmax.f32 %v984_v41, 0.0  ;;  %v1337_v50 = vadd.f32 %v1336_v48, %v345_v32  ;;  %v1338_v51 = vpop.f32.mrb[47].mxu1  ;;  %2212 = vmatpush1.bf16.msra.mxu1 %v1839_v33  ;;  %v1631_v55 = vmax.f32 %v1333_v42, 0.0 }
 0x149   :  { %v1634_v52 = vmax.f32 %v986_v46, 0.0  ;;  %v1339_v53 = vadd.f32 %v1338_v51, %v345_v32  ;;  %v1632_v59 = vmax.f32 %v1335_v47, 0.0 }
 0x14a   :  { %v1841_v54 = vpack.c.bf16 %v1633_v49, %v1629_v40  ;;  %v1635_v56 = vmax.f32 %v1337_v50, 0.0 }
 0x14b   :  { %v1842_v58 = vpack.c.bf16 %v1634_v52, %v1630_v45  ;;  %v1636_v60 = vmax.f32 %v1339_v53, 0.0  ;;  %v989_v61 = vpop.f32.mrb[48].mxu0 }
 0x14c   :  { %v1843_v63 = vpack.c.bf16 %v1635_v56, %v1631_v55  ;;  %v990_v0 = vadd.f32 %v989_v61, %v350_v57  ;;  %v991_v1 = vpop.f32.mrb[49].mxu0  ;;  %v370_v56 = vpop.permute.xlu0 %369 }
 0x14d   :  { %v1844_v3 = vpack.c.bf16 %v1636_v60, %v1632_v59  ;;  %v992_v4 = vadd.f32 %v991_v1, %v350_v57  ;;  %v993_v5 = vpop.f32.mrb[50].mxu0  ;;  %v1342_v6 = vpop.f32.mrb[48].mxu1  ;;  %2067 = vmatprep.subr.bf16.mxu0 %v1842_v58 }
 0x14e   :  { %v1637_v7 = vmax.f32 %v990_v0, 0.0  ;;  %v994_v8 = vadd.f32 %v993_v5, %v355_v62  ;;  %v1343_v9 = vadd.f32 %v1342_v6, %v350_v57  ;;  %v995_v10 = vpop.f32.mrb[51].mxu0  ;;  %v1344_v12 = vpop.f32.mrb[49].mxu1  ;;  %2068 = vmatpush1.bf16.msra.mxu0 %v1841_v54 }
 0x14f   :  { %v1638_v13 = vmax.f32 %v992_v4, 0.0  ;;  %v996_v14 = vadd.f32 %v995_v10, %v355_v62  ;;  %v1345_v15 = vadd.f32 %v1344_v12, %v350_v57  ;;  %v1346_v16 = vpop.f32.mrb[50].mxu1  ;;  %2213 = vmatprep.subr.bf16.mxu1 %v1844_v3  ;;  %v375_v61 = vpop.permute.xlu1 %374 }
 0x150   :  { %v1641_v18 = vmax.f32 %v994_v8, 0.0  ;;  %v1347_v19 = vadd.f32 %v1346_v16, %v355_v62  ;;  %v1348_v20 = vpop.f32.mrb[51].mxu1  ;;  %2214 = vmatpush1.bf16.msra.mxu1 %v1843_v63  ;;  %v1639_v24 = vmax.f32 %v1343_v9, 0.0 }
 0x151   :  { %v1642_v21 = vmax.f32 %v996_v14, 0.0  ;;  %v1349_v22 = vadd.f32 %v1348_v20, %v355_v62  ;;  %v1640_v28 = vmax.f32 %v1345_v15, 0.0 }
 0x152   :  { %v1845_v23 = vpack.c.bf16 %v1641_v18, %v1637_v7  ;;  %v1643_v25 = vmax.f32 %v1347_v19, 0.0 }
 0x153   :  { %v1846_v27 = vpack.c.bf16 %v1642_v21, %v1638_v13  ;;  %v1644_v29 = vmax.f32 %v1349_v22, 0.0  ;;  %v999_v30 = vpop.f32.mrb[52].mxu0 }
 0x154   :  { %v1847_v32 = vpack.c.bf16 %v1643_v25, %v1639_v24  ;;  %v1000_v33 = vadd.f32 %v999_v30, %v360_v26  ;;  %v1001_v34 = vpop.f32.mrb[53].mxu0  ;;  %v380_v25 = vpop.permute.xlu0 %379 }
 0x155   :  { %v1848_v35 = vpack.c.bf16 %v1644_v29, %v1640_v28  ;;  %v1002_v36 = vadd.f32 %v1001_v34, %v360_v26  ;;  %v1003_v37 = vpop.f32.mrb[54].mxu0  ;;  %v1352_v38 = vpop.f32.mrb[52].mxu1  ;;  %2069 = vmatprep.subr.bf16.mxu0 %v1846_v27 }
 0x156   :  { %v1645_v39 = vmax.f32 %v1000_v33, 0.0  ;;  %v1004_v40 = vadd.f32 %v1003_v37, %v365_v31  ;;  %v1353_v41 = vadd.f32 %v1352_v38, %v360_v26  ;;  %v1005_v42 = vpop.f32.mrb[55].mxu0  ;;  %v1354_v43 = vpop.f32.mrb[53].mxu1  ;;  %2070 = vmatpush1.bf16.msra.mxu0 %v1845_v23 }
 0x157   :  { %v1646_v44 = vmax.f32 %v1002_v36, 0.0  ;;  %v1006_v45 = vadd.f32 %v1005_v42, %v365_v31  ;;  %v1355_v46 = vadd.f32 %v1354_v43, %v360_v26  ;;  %v1356_v47 = vpop.f32.mrb[54].mxu1  ;;  %2215 = vmatprep.subr.bf16.mxu1 %v1848_v35  ;;  %v385_v30 = vpop.permute.xlu1 %384 }
 0x158   :  { %v1649_v48 = vmax.f32 %v1004_v40, 0.0  ;;  %v1357_v49 = vadd.f32 %v1356_v47, %v365_v31  ;;  %v1358_v50 = vpop.f32.mrb[55].mxu1  ;;  %2216 = vmatpush1.bf16.msra.mxu1 %v1847_v32  ;;  %v1647_v54 = vmax.f32 %v1353_v41, 0.0 }
 0x159   :  { %v1650_v51 = vmax.f32 %v1006_v45, 0.0  ;;  %v1359_v52 = vadd.f32 %v1358_v50, %v365_v31  ;;  %v1648_v58 = vmax.f32 %v1355_v46, 0.0 }
 0x15a   :  { %v1849_v53 = vpack.c.bf16 %v1649_v48, %v1645_v39  ;;  %v1651_v55 = vmax.f32 %v1357_v49, 0.0 }
 0x15b   :  { %v1850_v57 = vpack.c.bf16 %v1650_v51, %v1646_v44  ;;  %v1652_v59 = vmax.f32 %v1359_v52, 0.0  ;;  %v1009_v60 = vpop.f32.mrb[56].mxu0 }
 0x15c   :  { %v1851_v62 = vpack.c.bf16 %v1651_v55, %v1647_v54  ;;  %v1010_v63 = vadd.f32 %v1009_v60, %v370_v56  ;;  %v1011_v0 = vpop.f32.mrb[57].mxu0  ;;  %v390_v55 = vpop.permute.xlu0 %389 }
 0x15d   :  { %v1852_v1 = vpack.c.bf16 %v1652_v59, %v1648_v58  ;;  %v1012_v3 = vadd.f32 %v1011_v0, %v370_v56  ;;  %v1013_v4 = vpop.f32.mrb[58].mxu0  ;;  %v1362_v5 = vpop.f32.mrb[56].mxu1  ;;  %2071 = vmatprep.subr.bf16.mxu0 %v1850_v57 }
 0x15e   :  { %v1653_v6 = vmax.f32 %v1010_v63, 0.0  ;;  %v1014_v7 = vadd.f32 %v1013_v4, %v375_v61  ;;  %v1363_v8 = vadd.f32 %v1362_v5, %v370_v56  ;;  %v1015_v9 = vpop.f32.mrb[59].mxu0  ;;  %v1364_v10 = vpop.f32.mrb[57].mxu1  ;;  %2072 = vmatpush1.bf16.msra.mxu0 %v1849_v53  ;;  %v3002_v5 = vld [vmem:[%s3783_s3] ss:$16 sps:$4 sm:$0xff]  }
 0x15f   :  { %v1654_v12 = vmax.f32 %v1012_v3, 0.0  ;;  %v1016_v13 = vadd.f32 %v1015_v9, %v375_v61  ;;  %v1365_v14 = vadd.f32 %v1364_v10, %v370_v56  ;;  %v1366_v15 = vpop.f32.mrb[58].mxu1  ;;  %2217 = vmatprep.subr.bf16.mxu1 %v1852_v1  ;;  %v395_v60 = vpop.permute.xlu1 %394  ;;  %v3005_v10 = vld [vmem:[%s3783_s3 + $0x24] ss:$16 sps:$4 sm:$0xff]  }
 0x160   :  { %v1657_v16 = vmax.f32 %v1014_v7, 0.0  ;;  %v1367_v18 = vadd.f32 %v1366_v15, %v375_v61  ;;  %v1368_v19 = vpop.f32.mrb[59].mxu1  ;;  %2218 = vmatpush1.bf16.msra.mxu1 %v1851_v62  ;;  %v1655_v23 = vmax.f32 %v1363_v8, 0.0 }
 0x161   :  { %v1658_v20 = vmax.f32 %v1016_v13, 0.0  ;;  %v1369_v21 = vadd.f32 %v1368_v19, %v375_v61  ;;  %v1656_v27 = vmax.f32 %v1365_v14, 0.0 }
 0x162   :  { %v1853_v22 = vpack.c.bf16 %v1657_v16, %v1653_v6  ;;  %v1659_v24 = vmax.f32 %v1367_v18, 0.0 }
 0x163   :  { %v1854_v26 = vpack.c.bf16 %v1658_v20, %v1654_v12  ;;  %v1660_v28 = vmax.f32 %v1369_v21, 0.0  ;;  %v1019_v29 = vpop.f32.mrb[60].mxu0 }
 0x164   :  { %v1855_v31 = vpack.c.bf16 %v1659_v24, %v1655_v23  ;;  %v1020_v32 = vadd.f32 %v1019_v29, %v380_v25  ;;  %v1021_v33 = vpop.f32.mrb[61].mxu0 }
 0x165   :  { %v1856_v34 = vpack.c.bf16 %v1660_v28, %v1656_v27  ;;  %v1022_v35 = vadd.f32 %v1021_v33, %v380_v25  ;;  %v1023_v36 = vpop.f32.mrb[62].mxu0  ;;  %v1372_v37 = vpop.f32.mrb[60].mxu1  ;;  %2073 = vmatprep.subr.bf16.mxu0 %v1854_v26 }
 0x166   :  { %v1661_v38 = vmax.f32 %v1020_v32, 0.0  ;;  %v1024_v39 = vadd.f32 %v1023_v36, %v385_v30  ;;  %v1373_v40 = vadd.f32 %v1372_v37, %v380_v25  ;;  %v1025_v41 = vpop.f32.mrb[63].mxu0  ;;  %v1374_v42 = vpop.f32.mrb[61].mxu1  ;;  %2074 = vmatpush1.bf16.msra.mxu0 %v1853_v22 }
 0x167   :  { %v1662_v43 = vmax.f32 %v1022_v35, 0.0  ;;  %v1026_v44 = vadd.f32 %v1025_v41, %v385_v30  ;;  %v1375_v45 = vadd.f32 %v1374_v42, %v380_v25  ;;  %v1376_v46 = vpop.f32.mrb[62].mxu1  ;;  %2219 = vmatprep.subr.bf16.mxu1 %v1856_v34  ;;  %v400_v26 = vpop.permute.xlu0 %399 }
 0x168   :  { %v1665_v47 = vmax.f32 %v1024_v39, 0.0  ;;  %v1377_v48 = vadd.f32 %v1376_v46, %v385_v30  ;;  %v1378_v49 = vpop.f32.mrb[63].mxu1  ;;  %2220 = vmatpush1.bf16.msra.mxu1 %v1855_v31  ;;  %v1663_v53 = vmax.f32 %v1373_v40, 0.0  ;;  %v405_v31 = vpop.permute.xlu1 %404  ;;  %v3007_v39 = vld [vmem:[%s3783_s3 + $0x20] ss:$16 sps:$4 sm:$0xff]  }
 0x169   :  { %v1666_v50 = vmax.f32 %v1026_v44, 0.0  ;;  %v1379_v51 = vadd.f32 %v1378_v49, %v385_v30  ;;  %v1664_v57 = vmax.f32 %v1375_v45, 0.0  ;;  %v3008_v44 = vld [vmem:[%s3783_s3 + $0x44] ss:$16 sps:$4 sm:$0xff]  }
 0x16a   :  { %v1857_v52 = vpack.c.bf16 %v1665_v47, %v1661_v38  ;;  %v1667_v54 = vmax.f32 %v1377_v48, 0.0 }
 0x16b   :  { %v1858_v56 = vpack.c.bf16 %v1666_v50, %v1662_v43  ;;  %v1668_v58 = vmax.f32 %v1379_v51, 0.0  ;;  %v1029_v59 = vpop.f32.mrb[64].mxu0 }
 0x16c   :  { %v1859_v61 = vpack.c.bf16 %v1667_v54, %v1663_v53  ;;  %v1030_v62 = vadd.f32 %v1029_v59, %v390_v55  ;;  %v1031_v63 = vpop.f32.mrb[65].mxu0 }
 0x16d   :  { %v1860_v0 = vpack.c.bf16 %v1668_v58, %v1664_v57  ;;  %v1032_v1 = vadd.f32 %v1031_v63, %v390_v55  ;;  %v1033_v3 = vpop.f32.mrb[66].mxu0  ;;  %v1382_v4 = vpop.f32.mrb[64].mxu1  ;;  %2075 = vmatprep.subr.bf16.mxu0 %v1858_v56 }
 0x16e   :  { %v1034_v6 = vadd.f32 %v1033_v3, %v395_v60  ;;  %v1383_v7 = vadd.f32 %v1382_v4, %v390_v55  ;;  %v1035_v8 = vpop.f32.mrb[67].mxu0  ;;  %v1384_v9 = vpop.f32.mrb[65].mxu1  ;;  %2076 = vmatpush1.bf16.msra.mxu0 %v1857_v52  ;;  %v1669_v15 = vmax.f32 %v1030_v62, 0.0 }
 0x16f   :  { %v1036_v12 = vadd.f32 %v1035_v8, %v395_v60  ;;  %v1385_v13 = vadd.f32 %v1384_v9, %v390_v55  ;;  %v1386_v14 = vpop.f32.mrb[66].mxu1  ;;  %2221 = vmatprep.subr.bf16.mxu1 %v1860_v0  ;;  %v1670_v20 = vmax.f32 %v1032_v1, 0.0  ;;  %v410_v58 = vpop.permute.xlu0 %409  ;;  %v3010_v8 = vld [vmem:[%s3783_s3 + $0x40] ss:$16 sps:$4 sm:$0xff]  }
 0x170   :  { %v1673_v16 = vmax.f32 %v1034_v6, 0.0  ;;  %v1387_v18 = vadd.f32 %v1386_v14, %v395_v60  ;;  %v1388_v19 = vpop.f32.mrb[67].mxu1  ;;  %2222 = vmatpush1.bf16.msra.mxu1 %v1859_v61  ;;  %v1671_v24 = vmax.f32 %v1383_v7, 0.0  ;;  %v415_v63 = vpop.permute.xlu1 %414  ;;  %v3011_v14 = vld [vmem:[%s3783_s3 + $0x64] ss:$16 sps:$4 sm:$0xff]  }
 0x171   :  { %v1674_v21 = vmax.f32 %v1036_v12, 0.0  ;;  %v1389_v22 = vadd.f32 %v1388_v19, %v395_v60  ;;  %2078 = vmatmul.mubr.bf16.vlgmr.msra.gmra.mrb[128].mxu0 %v3002_v5  ;;  %v1672_v28 = vmax.f32 %v1385_v13, 0.0 }
 0x172   :  { %v1861_v23 = vpack.c.bf16 %v1673_v16, %v1669_v15  ;;  %v1675_v25 = vmax.f32 %v1387_v18, 0.0  ;;  %2087 = vmatprep.mubr.bf16.mxu0 %v3005_v10 }
 0x173   :  { %v1862_v27 = vpack.c.bf16 %v1674_v21, %v1670_v20  ;;  %v1676_v29 = vmax.f32 %v1389_v22, 0.0  ;;  %v1039_v30 = vpop.f32.mrb[68].mxu0  ;;  %2224 = vmatmul.mubr.bf16.vlgmr.msra.gmra.mrb[128].mxu1 %v3002_v5 }
 0x174   :  { %v1863_v32 = vpack.c.bf16 %v1675_v25, %v1671_v24  ;;  %v1040_v33 = vadd.f32 %v1039_v30, %v400_v26  ;;  %v1041_v34 = vpop.f32.mrb[69].mxu0  ;;  %2233 = vmatprep.mubr.bf16.mxu1 %v3005_v10 }
 0x175   :  { %v1864_v35 = vpack.c.bf16 %v1676_v29, %v1672_v28  ;;  %v1042_v36 = vadd.f32 %v1041_v34, %v400_v26  ;;  %v1043_v37 = vpop.f32.mrb[70].mxu0  ;;  %v1392_v38 = vpop.f32.mrb[68].mxu1  ;;  %2118 = vmatprep.subr.bf16.mxu0 %v1862_v27 }
 0x176   :  { %v1044_v40 = vadd.f32 %v1043_v37, %v405_v31  ;;  %v1393_v41 = vadd.f32 %v1392_v38, %v400_v26  ;;  %v1045_v42 = vpop.f32.mrb[71].mxu0  ;;  %v1394_v43 = vpop.f32.mrb[69].mxu1  ;;  %2119 = vmatpush1.bf16.msra.mxu0 %v1861_v23  ;;  %v1677_v48 = vmax.f32 %v1040_v33, 0.0 }
 0x177   :  { %v1046_v45 = vadd.f32 %v1045_v42, %v405_v31  ;;  %v1395_v46 = vadd.f32 %v1394_v43, %v400_v26  ;;  %v1396_v47 = vpop.f32.mrb[70].mxu1  ;;  %2264 = vmatprep.subr.bf16.mxu1 %v1864_v35  ;;  %v1678_v52 = vmax.f32 %v1042_v36, 0.0  ;;  %v420_v29 = vpop.permute.xlu0 %419  ;;  %v3013_v42 = vld [vmem:[%s3783_s3 + $0x60] ss:$16 sps:$4 sm:$0xff]  }
 0x178   :  { %v1681_v49 = vmax.f32 %v1044_v40, 0.0  ;;  %v1397_v50 = vadd.f32 %v1396_v47, %v405_v31  ;;  %v1398_v51 = vpop.f32.mrb[71].mxu1  ;;  %2265 = vmatpush1.bf16.msra.mxu1 %v1863_v32  ;;  %v1679_v56 = vmax.f32 %v1393_v41, 0.0  ;;  %v425_v34 = vpop.permute.xlu1 %424  ;;  %v3016_v47 = vld [vmem:[%s3783_s3 + $0xc] ss:$16 sps:$4 sm:$0xff]  }
 0x179   :  { %v1682_v53 = vmax.f32 %v1046_v45, 0.0  ;;  %v1399_v54 = vadd.f32 %v1398_v51, %v405_v31  ;;  %2088 = vmatmul.mubr.bf16.gmra.mrb[132].mxu0 %v3007_v39  ;;  %v1680_v60 = vmax.f32 %v1395_v46, 0.0 }
 0x17a   :  { %v1865_v55 = vpack.c.bf16 %v1681_v49, %v1677_v48  ;;  %v1683_v57 = vmax.f32 %v1397_v50, 0.0  ;;  %2097 = vmatprep.mubr.bf16.mxu0 %v3008_v44 }
 0x17b   :  { %v1866_v59 = vpack.c.bf16 %v1682_v53, %v1678_v52  ;;  %v1684_v61 = vmax.f32 %v1399_v54, 0.0  ;;  %v1049_v62 = vpop.f32.mrb[72].mxu0  ;;  %2234 = vmatmul.mubr.bf16.gmra.mrb[132].mxu1 %v3007_v39 }
 0x17c   :  { %v1867_v0 = vpack.c.bf16 %v1683_v57, %v1679_v56  ;;  %v1050_v1 = vadd.f32 %v1049_v62, %v410_v58  ;;  %v1051_v3 = vpop.f32.mrb[73].mxu0  ;;  %2243 = vmatprep.mubr.bf16.mxu1 %v3008_v44 }
 0x17d   :  { %v1868_v4 = vpack.c.bf16 %v1684_v61, %v1680_v60  ;;  %v1052_v5 = vadd.f32 %v1051_v3, %v410_v58  ;;  %v1053_v6 = vpop.f32.mrb[74].mxu0  ;;  %v1402_v7 = vpop.f32.mrb[72].mxu1  ;;  %2120 = vmatprep.subr.bf16.mxu0 %v1866_v59 }
 0x17e   :  { %v1054_v9 = vadd.f32 %v1053_v6, %v415_v63  ;;  %v1403_v10 = vadd.f32 %v1402_v7, %v410_v58  ;;  %v1055_v12 = vpop.f32.mrb[75].mxu0  ;;  %v1404_v13 = vpop.f32.mrb[73].mxu1  ;;  %2121 = vmatpush1.bf16.msra.mxu0 %v1865_v55  ;;  %v1685_v19 = vmax.f32 %v1050_v1, 0.0 }
 0x17f   :  { %v1056_v15 = vadd.f32 %v1055_v12, %v415_v63  ;;  %v1405_v16 = vadd.f32 %v1404_v13, %v410_v58  ;;  %v1406_v18 = vpop.f32.mrb[74].mxu1  ;;  %2266 = vmatprep.subr.bf16.mxu1 %v1868_v4  ;;  %v1686_v23 = vmax.f32 %v1052_v5, 0.0  ;;  %v430_v61 = vpop.permute.xlu0 %429 }
 0x180   :  { %v1689_v20 = vmax.f32 %v1054_v9, 0.0  ;;  %v1407_v21 = vadd.f32 %v1406_v18, %v415_v63  ;;  %v1408_v22 = vpop.f32.mrb[75].mxu1  ;;  %2267 = vmatpush1.bf16.msra.mxu1 %v1867_v0  ;;  %v1687_v27 = vmax.f32 %v1403_v10, 0.0  ;;  %v435_v3 = vpop.permute.xlu1 %434 }
 0x181   :  { %v1690_v24 = vmax.f32 %v1056_v15, 0.0  ;;  %v1409_v25 = vadd.f32 %v1408_v22, %v415_v63  ;;  %2098 = vmatmul.mubr.bf16.gmra.mrb[136].mxu0 %v3010_v8  ;;  %v1688_v31 = vmax.f32 %v1405_v16, 0.0 }
 0x182   :  { %v1869_v26 = vpack.c.bf16 %v1689_v20, %v1685_v19  ;;  %v1691_v28 = vmax.f32 %v1407_v21, 0.0  ;;  %2107 = vmatprep.mubr.bf16.mxu0 %v3011_v14 }
 0x183   :  { %v1870_v30 = vpack.c.bf16 %v1690_v24, %v1686_v23  ;;  %v1692_v32 = vmax.f32 %v1409_v25, 0.0  ;;  %v1059_v33 = vpop.f32.mrb[76].mxu0  ;;  %2244 = vmatmul.mubr.bf16.gmra.mrb[136].mxu1 %v3010_v8 }
 0x184   :  { %v1871_v35 = vpack.c.bf16 %v1691_v28, %v1687_v27  ;;  %v1060_v36 = vadd.f32 %v1059_v33, %v420_v29  ;;  %v1061_v37 = vpop.f32.mrb[77].mxu0  ;;  %2253 = vmatprep.mubr.bf16.mxu1 %v3011_v14 }
 0x185   :  { %v1872_v38 = vpack.c.bf16 %v1692_v32, %v1688_v31  ;;  %v1062_v39 = vadd.f32 %v1061_v37, %v420_v29  ;;  %v1063_v40 = vpop.f32.mrb[78].mxu0  ;;  %v1412_v41 = vpop.f32.mrb[76].mxu1  ;;  %2122 = vmatprep.subr.bf16.mxu0 %v1870_v30 }
 0x186   :  { %v1064_v43 = vadd.f32 %v1063_v40, %v425_v34  ;;  %v1413_v44 = vadd.f32 %v1412_v41, %v420_v29  ;;  %v1065_v45 = vpop.f32.mrb[79].mxu0  ;;  %v1414_v46 = vpop.f32.mrb[77].mxu1  ;;  %2123 = vmatpush1.bf16.msra.mxu0 %v1869_v26  ;;  %v1693_v51 = vmax.f32 %v1060_v36, 0.0 }
 0x187   :  { %v1066_v48 = vadd.f32 %v1065_v45, %v425_v34  ;;  %v1415_v49 = vadd.f32 %v1414_v46, %v420_v29  ;;  %v1416_v50 = vpop.f32.mrb[78].mxu1  ;;  %2268 = vmatprep.subr.bf16.mxu1 %v1872_v38  ;;  %v1694_v55 = vmax.f32 %v1062_v39, 0.0  ;;  %v440_v30 = vpop.permute.xlu0 %439 }
 0x188   :  { %v1697_v52 = vmax.f32 %v1064_v43, 0.0  ;;  %v1417_v53 = vadd.f32 %v1416_v50, %v425_v34  ;;  %v1418_v54 = vpop.f32.mrb[79].mxu1  ;;  %2269 = vmatpush1.bf16.msra.mxu1 %v1871_v35  ;;  %v1695_v59 = vmax.f32 %v1413_v44, 0.0  ;;  %v445_v35 = vpop.permute.xlu1 %444 }
 0x189   :  { %v1698_v56 = vmax.f32 %v1066_v48, 0.0  ;;  %v1419_v57 = vadd.f32 %v1418_v54, %v425_v34  ;;  %2108 = vmatmul.mubr.bf16.gmra.mrb[140].mxu0 %v3013_v42  ;;  %v1696_v63 = vmax.f32 %v1415_v49, 0.0 }
 0x18a   :  { %v1873_v58 = vpack.c.bf16 %v1697_v52, %v1693_v51  ;;  %v1699_v60 = vmax.f32 %v1417_v53, 0.0  ;;  %2150 = vmatprep.mubr.bf16.mxu0 %v3016_v47 }
 0x18b   :  { %v1874_v62 = vpack.c.bf16 %v1698_v56, %v1694_v55  ;;  %v1700_v0 = vmax.f32 %v1419_v57, 0.0  ;;  %v1069_v1 = vpop.f32.mrb[80].mxu0  ;;  %2254 = vmatmul.mubr.bf16.gmra.mrb[140].mxu1 %v3013_v42 }
 0x18c   :  { %v1875_v4 = vpack.c.bf16 %v1699_v60, %v1695_v59  ;;  %v1070_v5 = vadd.f32 %v1069_v1, %v430_v61  ;;  %v1071_v6 = vpop.f32.mrb[81].mxu0  ;;  %2296 = vmatprep.mubr.bf16.mxu1 %v3016_v47  ;;  %v450_v60 = vpop.permute.xlu0 %449 }
 0x18d   :  { %v1876_v7 = vpack.c.bf16 %v1700_v0, %v1696_v63  ;;  %v1072_v8 = vadd.f32 %v1071_v6, %v430_v61  ;;  %v1073_v9 = vpop.f32.mrb[82].mxu0  ;;  %v1422_v10 = vpop.f32.mrb[80].mxu1  ;;  %2124 = vmatprep.subr.bf16.mxu0 %v1874_v62 }
 0x18e   :  { %v1074_v12 = vadd.f32 %v1073_v9, %v435_v3  ;;  %v1423_v13 = vadd.f32 %v1422_v10, %v430_v61  ;;  %v1075_v14 = vpop.f32.mrb[83].mxu0  ;;  %v1424_v15 = vpop.f32.mrb[81].mxu1  ;;  %2125 = vmatpush1.bf16.msra.mxu0 %v1873_v58  ;;  %v1701_v20 = vmax.f32 %v1070_v5, 0.0 }
 0x18f   :  { %v1076_v16 = vadd.f32 %v1075_v14, %v435_v3  ;;  %v1425_v18 = vadd.f32 %v1424_v15, %v430_v61  ;;  %v1426_v19 = vpop.f32.mrb[82].mxu1  ;;  %2270 = vmatprep.subr.bf16.mxu1 %v1876_v7  ;;  %v1702_v24 = vmax.f32 %v1072_v8, 0.0  ;;  %v455_v1 = vpop.permute.xlu1 %454 }
 0x190   :  { %v1705_v21 = vmax.f32 %v1074_v12, 0.0  ;;  %v1427_v22 = vadd.f32 %v1426_v19, %v435_v3  ;;  %v1428_v23 = vpop.f32.mrb[83].mxu1  ;;  %2271 = vmatpush1.bf16.msra.mxu1 %v1875_v4  ;;  %v1703_v28 = vmax.f32 %v1423_v13, 0.0 }
 0x191   :  { %v1706_v25 = vmax.f32 %v1076_v16, 0.0  ;;  %v1429_v26 = vadd.f32 %v1428_v23, %v435_v3  ;;  %v1704_v32 = vmax.f32 %v1425_v18, 0.0 }
 0x192   :  { %v1877_v27 = vpack.c.bf16 %v1705_v21, %v1701_v20  ;;  %v1707_v29 = vmax.f32 %v1427_v22, 0.0 }
 0x193   :  { %v1878_v31 = vpack.c.bf16 %v1706_v25, %v1702_v24  ;;  %v1708_v33 = vmax.f32 %v1429_v26, 0.0  ;;  %v1079_v34 = vpop.f32.mrb[84].mxu0 }
 0x194   :  { %v1879_v36 = vpack.c.bf16 %v1707_v29, %v1703_v28  ;;  %v1080_v37 = vadd.f32 %v1079_v34, %v440_v30  ;;  %v1081_v38 = vpop.f32.mrb[85].mxu0  ;;  %v460_v29 = vpop.permute.xlu0 %459 }
 0x195   :  { %v1880_v39 = vpack.c.bf16 %v1708_v33, %v1704_v32  ;;  %v1082_v40 = vadd.f32 %v1081_v38, %v440_v30  ;;  %v1083_v41 = vpop.f32.mrb[86].mxu0  ;;  %v1432_v42 = vpop.f32.mrb[84].mxu1  ;;  %2126 = vmatprep.subr.bf16.mxu0 %v1878_v31 }
 0x196   :  { %v1084_v43 = vadd.f32 %v1083_v41, %v445_v35  ;;  %v1433_v44 = vadd.f32 %v1432_v42, %v440_v30  ;;  %v1085_v45 = vpop.f32.mrb[87].mxu0  ;;  %v1434_v46 = vpop.f32.mrb[85].mxu1  ;;  %2127 = vmatpush1.bf16.msra.mxu0 %v1877_v27  ;;  %v1709_v50 = vmax.f32 %v1080_v37, 0.0 }
 0x197   :  { %v1086_v47 = vadd.f32 %v1085_v45, %v445_v35  ;;  %v1435_v48 = vadd.f32 %v1434_v46, %v440_v30  ;;  %v1436_v49 = vpop.f32.mrb[86].mxu1  ;;  %2272 = vmatprep.subr.bf16.mxu1 %v1880_v39  ;;  %v1710_v54 = vmax.f32 %v1082_v40, 0.0  ;;  %v465_v34 = vpop.permute.xlu1 %464 }
 0x198   :  { %v1713_v51 = vmax.f32 %v1084_v43, 0.0  ;;  %v1437_v52 = vadd.f32 %v1436_v49, %v445_v35  ;;  %v1438_v53 = vpop.f32.mrb[87].mxu1  ;;  %2273 = vmatpush1.bf16.msra.mxu1 %v1879_v36  ;;  %v1711_v58 = vmax.f32 %v1433_v44, 0.0 }
 0x199   :  { %v1714_v55 = vmax.f32 %v1086_v47, 0.0  ;;  %v1439_v56 = vadd.f32 %v1438_v53, %v445_v35  ;;  %v1712_v62 = vmax.f32 %v1435_v48, 0.0 }
 0x19a   :  { %v1881_v57 = vpack.c.bf16 %v1713_v51, %v1709_v50  ;;  %v1715_v59 = vmax.f32 %v1437_v52, 0.0 }
 0x19b   :  { %v1882_v61 = vpack.c.bf16 %v1714_v55, %v1710_v54  ;;  %v1716_v63 = vmax.f32 %v1439_v56, 0.0  ;;  %v1089_v0 = vpop.f32.mrb[88].mxu0 }
 0x19c   :  { %v1883_v3 = vpack.c.bf16 %v1715_v59, %v1711_v58  ;;  %v1090_v4 = vadd.f32 %v1089_v0, %v450_v60  ;;  %v1091_v5 = vpop.f32.mrb[89].mxu0  ;;  %v470_v59 = vpop.permute.xlu0 %469 }
 0x19d   :  { %v1884_v6 = vpack.c.bf16 %v1716_v63, %v1712_v62  ;;  %v1092_v7 = vadd.f32 %v1091_v5, %v450_v60  ;;  %v1093_v8 = vpop.f32.mrb[90].mxu0  ;;  %v1442_v9 = vpop.f32.mrb[88].mxu1  ;;  %2128 = vmatprep.subr.bf16.mxu0 %v1882_v61 }
 0x19e   :  { %v1094_v10 = vadd.f32 %v1093_v8, %v455_v1  ;;  %v1443_v12 = vadd.f32 %v1442_v9, %v450_v60  ;;  %v1095_v13 = vpop.f32.mrb[91].mxu0  ;;  %v1444_v14 = vpop.f32.mrb[89].mxu1  ;;  %2129 = vmatpush1.bf16.msra.mxu0 %v1881_v57  ;;  %v1717_v19 = vmax.f32 %v1090_v4, 0.0 }
 0x19f   :  { %v1096_v15 = vadd.f32 %v1095_v13, %v455_v1  ;;  %v1445_v16 = vadd.f32 %v1444_v14, %v450_v60  ;;  %v1446_v18 = vpop.f32.mrb[90].mxu1  ;;  %2274 = vmatprep.subr.bf16.mxu1 %v1884_v6  ;;  %v1718_v23 = vmax.f32 %v1092_v7, 0.0  ;;  %v475_v0 = vpop.permute.xlu1 %474 }
 0x1a0   :  { %v1721_v20 = vmax.f32 %v1094_v10, 0.0  ;;  %v1447_v21 = vadd.f32 %v1446_v18, %v455_v1  ;;  %v1448_v22 = vpop.f32.mrb[91].mxu1  ;;  %2275 = vmatpush1.bf16.msra.mxu1 %v1883_v3  ;;  %v1719_v27 = vmax.f32 %v1443_v12, 0.0 }
 0x1a1   :  { %v1722_v24 = vmax.f32 %v1096_v15, 0.0  ;;  %v1449_v25 = vadd.f32 %v1448_v22, %v455_v1  ;;  %v1720_v31 = vmax.f32 %v1445_v16, 0.0 }
 0x1a2   :  { %v1885_v26 = vpack.c.bf16 %v1721_v20, %v1717_v19  ;;  %v1723_v28 = vmax.f32 %v1447_v21, 0.0 }
 0x1a3   :  { %v1886_v30 = vpack.c.bf16 %v1722_v24, %v1718_v23  ;;  %v1724_v32 = vmax.f32 %v1449_v25, 0.0  ;;  %v1099_v33 = vpop.f32.mrb[92].mxu0 }
 0x1a4   :  { %v1887_v35 = vpack.c.bf16 %v1723_v28, %v1719_v27  ;;  %v1100_v36 = vadd.f32 %v1099_v33, %v460_v29  ;;  %v1101_v37 = vpop.f32.mrb[93].mxu0  ;;  %v480_v28 = vpop.permute.xlu0 %479 }
 0x1a5   :  { %v1888_v38 = vpack.c.bf16 %v1724_v32, %v1720_v31  ;;  %v1102_v39 = vadd.f32 %v1101_v37, %v460_v29  ;;  %v1103_v40 = vpop.f32.mrb[94].mxu0  ;;  %v1452_v41 = vpop.f32.mrb[92].mxu1  ;;  %2130 = vmatprep.subr.bf16.mxu0 %v1886_v30 }
 0x1a6   :  { %v1104_v42 = vadd.f32 %v1103_v40, %v465_v34  ;;  %v1453_v43 = vadd.f32 %v1452_v41, %v460_v29  ;;  %v1105_v44 = vpop.f32.mrb[95].mxu0  ;;  %v1454_v45 = vpop.f32.mrb[93].mxu1  ;;  %2131 = vmatpush1.bf16.msra.mxu0 %v1885_v26  ;;  %v1725_v49 = vmax.f32 %v1100_v36, 0.0 }
 0x1a7   :  { %v1106_v46 = vadd.f32 %v1105_v44, %v465_v34  ;;  %v1455_v47 = vadd.f32 %v1454_v45, %v460_v29  ;;  %v1456_v48 = vpop.f32.mrb[94].mxu1  ;;  %2276 = vmatprep.subr.bf16.mxu1 %v1888_v38  ;;  %v1726_v53 = vmax.f32 %v1102_v39, 0.0  ;;  %v485_v33 = vpop.permute.xlu1 %484 }
 0x1a8   :  { %v1729_v50 = vmax.f32 %v1104_v42, 0.0  ;;  %v1457_v51 = vadd.f32 %v1456_v48, %v465_v34  ;;  %v1458_v52 = vpop.f32.mrb[95].mxu1  ;;  %2277 = vmatpush1.bf16.msra.mxu1 %v1887_v35  ;;  %v1727_v57 = vmax.f32 %v1453_v43, 0.0 }
 0x1a9   :  { %v1730_v54 = vmax.f32 %v1106_v46, 0.0  ;;  %v1459_v55 = vadd.f32 %v1458_v52, %v465_v34  ;;  %v1728_v61 = vmax.f32 %v1455_v47, 0.0 }
 0x1aa   :  { %v1889_v56 = vpack.c.bf16 %v1729_v50, %v1725_v49  ;;  %v1731_v58 = vmax.f32 %v1457_v51, 0.0 }
 0x1ab   :  { %v1890_v60 = vpack.c.bf16 %v1730_v54, %v1726_v53  ;;  %v1732_v62 = vmax.f32 %v1459_v55, 0.0  ;;  %v1109_v63 = vpop.f32.mrb[96].mxu0 }
 0x1ac   :  { %v1891_v1 = vpack.c.bf16 %v1731_v58, %v1727_v57  ;;  %v1110_v3 = vadd.f32 %v1109_v63, %v470_v59  ;;  %v1111_v4 = vpop.f32.mrb[97].mxu0  ;;  %v490_v58 = vpop.permute.xlu0 %489 }
 0x1ad   :  { %v1892_v5 = vpack.c.bf16 %v1732_v62, %v1728_v61  ;;  %v1112_v6 = vadd.f32 %v1111_v4, %v470_v59  ;;  %v1113_v7 = vpop.f32.mrb[98].mxu0  ;;  %v1462_v8 = vpop.f32.mrb[96].mxu1  ;;  %2132 = vmatprep.subr.bf16.mxu0 %v1890_v60 }
 0x1ae   :  { %v1114_v9 = vadd.f32 %v1113_v7, %v475_v0  ;;  %v1463_v10 = vadd.f32 %v1462_v8, %v470_v59  ;;  %v1115_v12 = vpop.f32.mrb[99].mxu0  ;;  %v1464_v13 = vpop.f32.mrb[97].mxu1  ;;  %2133 = vmatpush1.bf16.msra.mxu0 %v1889_v56  ;;  %v1733_v18 = vmax.f32 %v1110_v3, 0.0 }
 0x1af   :  { %v1116_v14 = vadd.f32 %v1115_v12, %v475_v0  ;;  %v1465_v15 = vadd.f32 %v1464_v13, %v470_v59  ;;  %v1466_v16 = vpop.f32.mrb[98].mxu1  ;;  %2278 = vmatprep.subr.bf16.mxu1 %v1892_v5  ;;  %v1734_v22 = vmax.f32 %v1112_v6, 0.0  ;;  %v495_v63 = vpop.permute.xlu1 %494 }
 0x1b0   :  { %v1737_v19 = vmax.f32 %v1114_v9, 0.0  ;;  %v1467_v20 = vadd.f32 %v1466_v16, %v475_v0  ;;  %v1468_v21 = vpop.f32.mrb[99].mxu1  ;;  %2279 = vmatpush1.bf16.msra.mxu1 %v1891_v1  ;;  %v1735_v26 = vmax.f32 %v1463_v10, 0.0 }
 0x1b1   :  { %v1738_v23 = vmax.f32 %v1116_v14, 0.0  ;;  %v1469_v24 = vadd.f32 %v1468_v21, %v475_v0  ;;  %v1736_v30 = vmax.f32 %v1465_v15, 0.0 }
 0x1b2   :  { %v1893_v25 = vpack.c.bf16 %v1737_v19, %v1733_v18  ;;  %v1739_v27 = vmax.f32 %v1467_v20, 0.0 }
 0x1b3   :  { %v1894_v29 = vpack.c.bf16 %v1738_v23, %v1734_v22  ;;  %v1740_v31 = vmax.f32 %v1469_v24, 0.0  ;;  %v1119_v32 = vpop.f32.mrb[100].mxu0 }
 0x1b4   :  { %v1895_v34 = vpack.c.bf16 %v1739_v27, %v1735_v26  ;;  %v1120_v35 = vadd.f32 %v1119_v32, %v480_v28  ;;  %v1121_v36 = vpop.f32.mrb[101].mxu0  ;;  %v500_v27 = vpop.permute.xlu0 %499 }
 0x1b5   :  { %v1896_v37 = vpack.c.bf16 %v1740_v31, %v1736_v30  ;;  %v1122_v38 = vadd.f32 %v1121_v36, %v480_v28  ;;  %v1123_v39 = vpop.f32.mrb[102].mxu0  ;;  %v1472_v40 = vpop.f32.mrb[100].mxu1  ;;  %2134 = vmatprep.subr.bf16.mxu0 %v1894_v29 }
 0x1b6   :  { %v1124_v41 = vadd.f32 %v1123_v39, %v485_v33  ;;  %v1473_v42 = vadd.f32 %v1472_v40, %v480_v28  ;;  %v1125_v43 = vpop.f32.mrb[103].mxu0  ;;  %v1474_v44 = vpop.f32.mrb[101].mxu1  ;;  %2135 = vmatpush1.bf16.msra.mxu0 %v1893_v25  ;;  %v1741_v48 = vmax.f32 %v1120_v35, 0.0 }
 0x1b7   :  { %v1126_v45 = vadd.f32 %v1125_v43, %v485_v33  ;;  %v1475_v46 = vadd.f32 %v1474_v44, %v480_v28  ;;  %v1476_v47 = vpop.f32.mrb[102].mxu1  ;;  %2280 = vmatprep.subr.bf16.mxu1 %v1896_v37  ;;  %v1742_v52 = vmax.f32 %v1122_v38, 0.0  ;;  %v505_v32 = vpop.permute.xlu1 %504 }
 0x1b8   :  { %v1745_v49 = vmax.f32 %v1124_v41, 0.0  ;;  %v1477_v50 = vadd.f32 %v1476_v47, %v485_v33  ;;  %v1478_v51 = vpop.f32.mrb[103].mxu1  ;;  %2281 = vmatpush1.bf16.msra.mxu1 %v1895_v34  ;;  %v1743_v56 = vmax.f32 %v1473_v42, 0.0 }
 0x1b9   :  { %v1746_v53 = vmax.f32 %v1126_v45, 0.0  ;;  %v1479_v54 = vadd.f32 %v1478_v51, %v485_v33  ;;  %v1744_v60 = vmax.f32 %v1475_v46, 0.0 }
 0x1ba   :  { %v1897_v55 = vpack.c.bf16 %v1745_v49, %v1741_v48  ;;  %v1747_v57 = vmax.f32 %v1477_v50, 0.0 }
 0x1bb   :  { %v1898_v59 = vpack.c.bf16 %v1746_v53, %v1742_v52  ;;  %v1748_v61 = vmax.f32 %v1479_v54, 0.0  ;;  %v1129_v62 = vpop.f32.mrb[104].mxu0 }
 0x1bc   :  { %v1899_v0 = vpack.c.bf16 %v1747_v57, %v1743_v56  ;;  %v1130_v1 = vadd.f32 %v1129_v62, %v490_v58  ;;  %v1131_v3 = vpop.f32.mrb[105].mxu0  ;;  %v510_v57 = vpop.permute.xlu0 %509 }
 0x1bd   :  { %v1900_v4 = vpack.c.bf16 %v1748_v61, %v1744_v60  ;;  %v1132_v5 = vadd.f32 %v1131_v3, %v490_v58  ;;  %v1133_v6 = vpop.f32.mrb[106].mxu0  ;;  %v1482_v7 = vpop.f32.mrb[104].mxu1  ;;  %2136 = vmatprep.subr.bf16.mxu0 %v1898_v59 }
 0x1be   :  { %v1134_v8 = vadd.f32 %v1133_v6, %v495_v63  ;;  %v1483_v9 = vadd.f32 %v1482_v7, %v490_v58  ;;  %v1135_v10 = vpop.f32.mrb[107].mxu0  ;;  %v1484_v12 = vpop.f32.mrb[105].mxu1  ;;  %2137 = vmatpush1.bf16.msra.mxu0 %v1897_v55  ;;  %v1749_v16 = vmax.f32 %v1130_v1, 0.0 }
 0x1bf   :  { %v1136_v13 = vadd.f32 %v1135_v10, %v495_v63  ;;  %v1485_v14 = vadd.f32 %v1484_v12, %v490_v58  ;;  %v1486_v15 = vpop.f32.mrb[106].mxu1  ;;  %2282 = vmatprep.subr.bf16.mxu1 %v1900_v4  ;;  %v1750_v21 = vmax.f32 %v1132_v5, 0.0  ;;  %v515_v62 = vpop.permute.xlu1 %514 }
 0x1c0   :  { %v1753_v18 = vmax.f32 %v1134_v8, 0.0  ;;  %v1487_v19 = vadd.f32 %v1486_v15, %v495_v63  ;;  %v1488_v20 = vpop.f32.mrb[107].mxu1  ;;  %2283 = vmatpush1.bf16.msra.mxu1 %v1899_v0  ;;  %v1751_v25 = vmax.f32 %v1483_v9, 0.0 }
 0x1c1   :  { %v1754_v22 = vmax.f32 %v1136_v13, 0.0  ;;  %v1489_v23 = vadd.f32 %v1488_v20, %v495_v63  ;;  %v1752_v29 = vmax.f32 %v1485_v14, 0.0 }
 0x1c2   :  { %v1901_v24 = vpack.c.bf16 %v1753_v18, %v1749_v16  ;;  %v1755_v26 = vmax.f32 %v1487_v19, 0.0 }
 0x1c3   :  { %v1902_v28 = vpack.c.bf16 %v1754_v22, %v1750_v21  ;;  %v1756_v30 = vmax.f32 %v1489_v23, 0.0  ;;  %v1139_v31 = vpop.f32.mrb[108].mxu0 }
 0x1c4   :  { %v1903_v33 = vpack.c.bf16 %v1755_v26, %v1751_v25  ;;  %v1140_v34 = vadd.f32 %v1139_v31, %v500_v27  ;;  %v1141_v35 = vpop.f32.mrb[109].mxu0  ;;  %v520_v26 = vpop.permute.xlu0 %519 }
 0x1c5   :  { %v1904_v36 = vpack.c.bf16 %v1756_v30, %v1752_v29  ;;  %v1142_v37 = vadd.f32 %v1141_v35, %v500_v27  ;;  %v1143_v38 = vpop.f32.mrb[110].mxu0  ;;  %v1492_v39 = vpop.f32.mrb[108].mxu1  ;;  %2138 = vmatprep.subr.bf16.mxu0 %v1902_v28 }
 0x1c6   :  { %v1144_v40 = vadd.f32 %v1143_v38, %v505_v32  ;;  %v1493_v41 = vadd.f32 %v1492_v39, %v500_v27  ;;  %v1145_v42 = vpop.f32.mrb[111].mxu0  ;;  %v1494_v43 = vpop.f32.mrb[109].mxu1  ;;  %2139 = vmatpush1.bf16.msra.mxu0 %v1901_v24  ;;  %v1757_v47 = vmax.f32 %v1140_v34, 0.0 }
 0x1c7   :  { %v1146_v44 = vadd.f32 %v1145_v42, %v505_v32  ;;  %v1495_v45 = vadd.f32 %v1494_v43, %v500_v27  ;;  %v1496_v46 = vpop.f32.mrb[110].mxu1  ;;  %2284 = vmatprep.subr.bf16.mxu1 %v1904_v36  ;;  %v1758_v51 = vmax.f32 %v1142_v37, 0.0  ;;  %v525_v31 = vpop.permute.xlu1 %524 }
 0x1c8   :  { %v1761_v48 = vmax.f32 %v1144_v40, 0.0  ;;  %v1497_v49 = vadd.f32 %v1496_v46, %v505_v32  ;;  %v1498_v50 = vpop.f32.mrb[111].mxu1  ;;  %2285 = vmatpush1.bf16.msra.mxu1 %v1903_v33  ;;  %v1759_v55 = vmax.f32 %v1493_v41, 0.0 }
 0x1c9   :  { %v1762_v52 = vmax.f32 %v1146_v44, 0.0  ;;  %v1499_v53 = vadd.f32 %v1498_v50, %v505_v32  ;;  %v1760_v59 = vmax.f32 %v1495_v45, 0.0 }
 0x1ca   :  { %v1905_v54 = vpack.c.bf16 %v1761_v48, %v1757_v47  ;;  %v1763_v56 = vmax.f32 %v1497_v49, 0.0 }
 0x1cb   :  { %v1906_v58 = vpack.c.bf16 %v1762_v52, %v1758_v51  ;;  %v1764_v60 = vmax.f32 %v1499_v53, 0.0  ;;  %v1149_v61 = vpop.f32.mrb[112].mxu0 }
 0x1cc   :  { %v1907_v63 = vpack.c.bf16 %v1763_v56, %v1759_v55  ;;  %v1150_v0 = vadd.f32 %v1149_v61, %v510_v57  ;;  %v1151_v1 = vpop.f32.mrb[113].mxu0  ;;  %v530_v56 = vpop.permute.xlu0 %529 }
 0x1cd   :  { %v1908_v3 = vpack.c.bf16 %v1764_v60, %v1760_v59  ;;  %v1152_v4 = vadd.f32 %v1151_v1, %v510_v57  ;;  %v1153_v5 = vpop.f32.mrb[114].mxu0  ;;  %v1502_v6 = vpop.f32.mrb[112].mxu1  ;;  %2140 = vmatprep.subr.bf16.mxu0 %v1906_v58 }
 0x1ce   :  { %v1154_v7 = vadd.f32 %v1153_v5, %v515_v62  ;;  %v1503_v8 = vadd.f32 %v1502_v6, %v510_v57  ;;  %v1155_v9 = vpop.f32.mrb[115].mxu0  ;;  %v1504_v10 = vpop.f32.mrb[113].mxu1  ;;  %2141 = vmatpush1.bf16.msra.mxu0 %v1905_v54  ;;  %v1765_v15 = vmax.f32 %v1150_v0, 0.0 }
 0x1cf   :  { %v1156_v12 = vadd.f32 %v1155_v9, %v515_v62  ;;  %v1505_v13 = vadd.f32 %v1504_v10, %v510_v57  ;;  %v1506_v14 = vpop.f32.mrb[114].mxu1  ;;  %2286 = vmatprep.subr.bf16.mxu1 %v1908_v3  ;;  %v1766_v20 = vmax.f32 %v1152_v4, 0.0  ;;  %v535_v61 = vpop.permute.xlu1 %534 }
 0x1d0   :  { %v1769_v16 = vmax.f32 %v1154_v7, 0.0  ;;  %v1507_v18 = vadd.f32 %v1506_v14, %v515_v62  ;;  %v1508_v19 = vpop.f32.mrb[115].mxu1  ;;  %2287 = vmatpush1.bf16.msra.mxu1 %v1907_v63  ;;  %v1767_v24 = vmax.f32 %v1503_v8, 0.0 }
 0x1d1   :  { %v1770_v21 = vmax.f32 %v1156_v12, 0.0  ;;  %v1509_v22 = vadd.f32 %v1508_v19, %v515_v62  ;;  %v1768_v28 = vmax.f32 %v1505_v13, 0.0 }
 0x1d2   :  { %v1909_v23 = vpack.c.bf16 %v1769_v16, %v1765_v15  ;;  %v1771_v25 = vmax.f32 %v1507_v18, 0.0 }
 0x1d3   :  { %v1910_v27 = vpack.c.bf16 %v1770_v21, %v1766_v20  ;;  %v1772_v29 = vmax.f32 %v1509_v22, 0.0  ;;  %v1159_v30 = vpop.f32.mrb[116].mxu0 }
 0x1d4   :  { %v1911_v32 = vpack.c.bf16 %v1771_v25, %v1767_v24  ;;  %v1160_v33 = vadd.f32 %v1159_v30, %v520_v26  ;;  %v1161_v34 = vpop.f32.mrb[117].mxu0  ;;  %v540_v25 = vpop.permute.xlu0 %539 }
 0x1d5   :  { %v1912_v35 = vpack.c.bf16 %v1772_v29, %v1768_v28  ;;  %v1162_v36 = vadd.f32 %v1161_v34, %v520_v26  ;;  %v1163_v37 = vpop.f32.mrb[118].mxu0  ;;  %v1512_v38 = vpop.f32.mrb[116].mxu1  ;;  %2142 = vmatprep.subr.bf16.mxu0 %v1910_v27 }
 0x1d6   :  { %v1164_v39 = vadd.f32 %v1163_v37, %v525_v31  ;;  %v1513_v40 = vadd.f32 %v1512_v38, %v520_v26  ;;  %v1165_v41 = vpop.f32.mrb[119].mxu0  ;;  %v1514_v42 = vpop.f32.mrb[117].mxu1  ;;  %2143 = vmatpush1.bf16.msra.mxu0 %v1909_v23  ;;  %v1773_v46 = vmax.f32 %v1160_v33, 0.0 }
 0x1d7   :  { %v1166_v43 = vadd.f32 %v1165_v41, %v525_v31  ;;  %v1515_v44 = vadd.f32 %v1514_v42, %v520_v26  ;;  %v1516_v45 = vpop.f32.mrb[118].mxu1  ;;  %2288 = vmatprep.subr.bf16.mxu1 %v1912_v35  ;;  %v1774_v50 = vmax.f32 %v1162_v36, 0.0  ;;  %v545_v30 = vpop.permute.xlu1 %544 }
 0x1d8   :  { %v1777_v47 = vmax.f32 %v1164_v39, 0.0  ;;  %v1517_v48 = vadd.f32 %v1516_v45, %v525_v31  ;;  %v1518_v49 = vpop.f32.mrb[119].mxu1  ;;  %2289 = vmatpush1.bf16.msra.mxu1 %v1911_v32  ;;  %v1775_v54 = vmax.f32 %v1513_v40, 0.0 }
 0x1d9   :  { %v1778_v51 = vmax.f32 %v1166_v43, 0.0  ;;  %v1519_v52 = vadd.f32 %v1518_v49, %v525_v31  ;;  %v1776_v58 = vmax.f32 %v1515_v44, 0.0 }
 0x1da   :  { %v1913_v53 = vpack.c.bf16 %v1777_v47, %v1773_v46  ;;  %v1779_v55 = vmax.f32 %v1517_v48, 0.0 }
 0x1db   :  { %v1914_v57 = vpack.c.bf16 %v1778_v51, %v1774_v50  ;;  %v1780_v59 = vmax.f32 %v1519_v52, 0.0  ;;  %v1169_v60 = vpop.f32.mrb[120].mxu0 }
 0x1dc   :  { %v1915_v62 = vpack.c.bf16 %v1779_v55, %v1775_v54  ;;  %v1170_v63 = vadd.f32 %v1169_v60, %v530_v56  ;;  %v1171_v0 = vpop.f32.mrb[121].mxu0  ;;  %v3014_v60 = vld [vmem:[%s3783_s3 + $0x8] ss:$16 sps:$4 sm:$0xff]  }
 0x1dd   :  { %v1916_v1 = vpack.c.bf16 %v1780_v59, %v1776_v58  ;;  %v1172_v3 = vadd.f32 %v1171_v0, %v530_v56  ;;  %v1173_v4 = vpop.f32.mrb[122].mxu0  ;;  %v1522_v5 = vpop.f32.mrb[120].mxu1  ;;  %2144 = vmatprep.subr.bf16.mxu0 %v1914_v57  ;;  %v3022_v0 = vld [vmem:[%s3783_s3 + $0x48] ss:$16 sps:$4 sm:$0xff]  }
 0x1de   :  { %v1174_v6 = vadd.f32 %v1173_v4, %v535_v61  ;;  %v1523_v7 = vadd.f32 %v1522_v5, %v530_v56  ;;  %v1175_v8 = vpop.f32.mrb[123].mxu0  ;;  %v1524_v9 = vpop.f32.mrb[121].mxu1  ;;  %2145 = vmatpush1.bf16.msra.mxu0 %v1913_v53  ;;  %v1781_v14 = vmax.f32 %v1170_v63, 0.0  ;;  %v3020_v63 = vld [vmem:[%s3783_s3 + $0x4c] ss:$16 sps:$4 sm:$0xff]  }
 0x1df   :  { %v1176_v10 = vadd.f32 %v1175_v8, %v535_v61  ;;  %v1525_v12 = vadd.f32 %v1524_v9, %v530_v56  ;;  %v1526_v13 = vpop.f32.mrb[122].mxu1  ;;  %2290 = vmatprep.subr.bf16.mxu1 %v1916_v1  ;;  %v1782_v19 = vmax.f32 %v1172_v3, 0.0  ;;  %v3023_v1 = vld [vmem:[%s3783_s3 + $0x6c] ss:$16 sps:$4 sm:$0xff]   ;;  %v3025_v3 = vld [vmem:[%s3783_s3 + $0x68] ss:$16 sps:$4 sm:$0xff]   ;;  %v1928_v4 = vpop.permute.xlu0 %1927 }
 0x1e0   :  { %v1785_v15 = vmax.f32 %v1174_v6, 0.0  ;;  %v1527_v16 = vadd.f32 %v1526_v13, %v535_v61  ;;  %v1528_v18 = vpop.f32.mrb[123].mxu1  ;;  %2291 = vmatpush1.bf16.msra.mxu1 %v1915_v62  ;;  %v1783_v23 = vmax.f32 %v1523_v7, 0.0  ;;  %v3019_v62 = vld [vmem:[%s3783_s3 + $0x28] ss:$16 sps:$4 sm:$0xff]   ;;  %v1933_v6 = vpop.permute.xlu1 %1932 }
 0x1e1   :  { %v1786_v20 = vmax.f32 %v1176_v10, 0.0  ;;  %v1529_v21 = vadd.f32 %v1528_v18, %v535_v61  ;;  %v1784_v27 = vmax.f32 %v1525_v12, 0.0  ;;  %v3017_v61 = vld [vmem:[%s3783_s3 + $0x2c] ss:$16 sps:$4 sm:$0xff]  }
 0x1e2   :  { %v1917_v22 = vpack.c.bf16 %v1785_v15, %v1781_v14  ;;  %v1787_v24 = vmax.f32 %v1527_v16, 0.0 }
 0x1e3   :  { %v1918_v26 = vpack.c.bf16 %v1786_v20, %v1782_v19  ;;  %v1788_v28 = vmax.f32 %v1529_v21, 0.0  ;;  %v1179_v29 = vpop.f32.mrb[124].mxu0 }
 0x1e4   :  { %v1919_v31 = vpack.c.bf16 %v1787_v24, %v1783_v23  ;;  %v1180_v32 = vadd.f32 %v1179_v29, %v540_v25  ;;  %v1181_v33 = vpop.f32.mrb[125].mxu0 }
 0x1e5   :  { %v1920_v34 = vpack.c.bf16 %v1788_v28, %v1784_v27  ;;  %v1182_v35 = vadd.f32 %v1181_v33, %v540_v25  ;;  %v1183_v36 = vpop.f32.mrb[126].mxu0  ;;  %v1532_v37 = vpop.f32.mrb[124].mxu1  ;;  %2146 = vmatprep.subr.bf16.mxu0 %v1918_v26 }
 0x1e6   :  { %v1184_v38 = vadd.f32 %v1183_v36, %v545_v30  ;;  %v1533_v39 = vadd.f32 %v1532_v37, %v540_v25  ;;  %v1185_v40 = vpop.f32.mrb[127].mxu0  ;;  %v1534_v41 = vpop.f32.mrb[125].mxu1  ;;  %2147 = vmatpush1.bf16.msra.mxu0 %v1917_v22  ;;  %v1789_v45 = vmax.f32 %v1180_v32, 0.0 }
 0x1e7   :  { %v1186_v42 = vadd.f32 %v1185_v40, %v545_v30  ;;  %v1535_v43 = vadd.f32 %v1534_v41, %v540_v25  ;;  %v1536_v44 = vpop.f32.mrb[126].mxu1  ;;  %2292 = vmatprep.subr.bf16.mxu1 %v1920_v34  ;;  %v1790_v49 = vmax.f32 %v1182_v35, 0.0  ;;  %v1943_v36 = vpop.permute.xlu1 %1942 }
 0x1e8   :  { %v1793_v46 = vmax.f32 %v1184_v38, 0.0  ;;  %v1537_v47 = vadd.f32 %v1536_v44, %v545_v30  ;;  %v1538_v48 = vpop.f32.mrb[127].mxu1  ;;  %2293 = vmatpush1.bf16.msra.mxu1 %v1919_v31  ;;  %v1791_v53 = vmax.f32 %v1533_v39, 0.0  ;;  %v1938_v31 = vpop.permute.xlu0 %1937 }
 0x1e9   :  { %v1794_v50 = vmax.f32 %v1186_v42, 0.0  ;;  %v1539_v51 = vadd.f32 %v1538_v48, %v545_v30  ;;  %v1792_v56 = vmax.f32 %v1535_v43, 0.0 }
 0x1ea   :  { %v1921_v52 = vpack.c.bf16 %v1793_v46, %v1789_v45  ;;  %v1795_v54 = vmax.f32 %v1537_v47, 0.0 }
 0x1eb   :  { %v1922_v55 = vpack.c.bf16 %v1794_v50, %v1790_v49  ;;  %v1796_v57 = vmax.f32 %v1539_v51, 0.0 }
 0x1ec   :  { %v1923_v58 = vpack.c.bf16 %v1795_v54, %v1791_v53 }
 0x1ed   :  { %v1924_v59 = vpack.c.bf16 %v1796_v57, %v1792_v56  ;;  %2148 = vmatprep.subr.bf16.mxu0 %v1922_v55 }
 0x1ee   :  { %2149 = vmatpush1.bf16.msra.mxu0 %v1921_v52 }
 0x1ef   :  { %2294 = vmatprep.subr.bf16.mxu1 %v1924_v59 }
 0x1f0   :  { %2295 = vmatpush1.bf16.msra.mxu1 %v1923_v58 }
 0x1f1   :  { %2151 = vmatmul.mubr.bf16.vlgmr.msra.gmra.mrb[128].mxu0 %v3014_v60 }
 0x1f2   :  { %2160 = vmatprep.mubr.bf16.mxu0 %v3017_v61 }
 0x1f3   :  { %2297 = vmatmul.mubr.bf16.vlgmr.msra.gmra.mrb[128].mxu1 %v3014_v60 }
 0x1f4   :  { %2306 = vmatprep.mubr.bf16.mxu1 %v3017_v61  ;;  %v1948_v61 = vpop.permute.xlu0 %1947 }
 0x1f9   :  { %2161 = vmatmul.mubr.bf16.gmra.mrb[132].mxu0 %v3019_v62 }
 0x1fa   :  { %2170 = vmatprep.mubr.bf16.mxu0 %v3020_v63 }
 0x1fb   :  { %2307 = vmatmul.mubr.bf16.gmra.mrb[132].mxu1 %v3019_v62 }
 0x1fc   :  { %2316 = vmatprep.mubr.bf16.mxu1 %v3020_v63 }
 0x201   :  { %2171 = vmatmul.mubr.bf16.gmra.mrb[136].mxu0 %v3022_v0 }
 0x202   :  { %2180 = vmatprep.mubr.bf16.mxu0 %v3023_v1 }
 0x203   :  { %2317 = vmatmul.mubr.bf16.gmra.mrb[136].mxu1 %v3022_v0 }
 0x204   :  { %2326 = vmatprep.mubr.bf16.mxu1 %v3023_v1 }
 0x209   :  { %2181 = vmatmul.mubr.bf16.gmra.mrb[140].mxu0 %v3025_v3 }
 0x20a   :  { %2447 = vmatprep.mubr.bf16.mxu0 %v3112_v2 }
 0x20b   :  { %2327 = vmatmul.mubr.bf16.gmra.mrb[140].mxu1 %v3025_v3  ;;  %v1953_v3 = vpop.permute.xlu1 %1952 }
 0x20c   :  { %2498 = vmatprep.mubr.bf16.mxu1 %v3112_v2 }
 0x2c4   :  { %v2152_v5 = vpop.f32.mrb[128].mxu0 }
 0x2c5   :  { %v2892_v7 = vadd.f32 %v2152_v5, %v1928_v4  ;;  %v2154_v8 = vpop.f32.mrb[129].mxu0 }
 0x2c6   :  { %v2893_v9 = vadd.f32 %v2154_v8, %v1928_v4  ;;  %v2156_v10 = vpop.f32.mrb[130].mxu0  ;;  %v2298_v12 = vpop.f32.mrb[128].mxu1 }
 0x2c7   :  { %v2894_v13 = vadd.f32 %v2156_v10, %v1933_v6  ;;  %v2908_v14 = vadd.f32 %v2298_v12, %v1928_v4  ;;  %v2158_v15 = vpop.f32.mrb[131].mxu0  ;;  %v2300_v16 = vpop.f32.mrb[129].mxu1  ;;  %v2337_v21 = vmax.f32 %v2892_v7, 0.0 }
 0x2c8   :  { %v2895_v18 = vadd.f32 %v2158_v15, %v1933_v6  ;;  %v2909_v19 = vadd.f32 %v2300_v16, %v1928_v4  ;;  %v2302_v20 = vpop.f32.mrb[130].mxu1  ;;  %v2338_v25 = vmax.f32 %v2893_v9, 0.0 }
 0x2c9   :  { %v2341_v22 = vmax.f32 %v2894_v13, 0.0  ;;  %v2910_v23 = vadd.f32 %v2302_v20, %v1933_v6  ;;  %v2304_v24 = vpop.f32.mrb[131].mxu1  ;;  %v2339_v29 = vmax.f32 %v2908_v14, 0.0 }
 0x2ca   :  { %v2342_v26 = vmax.f32 %v2895_v18, 0.0  ;;  %v2911_v27 = vadd.f32 %v2304_v24, %v1933_v6  ;;  %v2340_v33 = vmax.f32 %v2909_v19, 0.0 }
 0x2cb   :  { %v2369_v28 = vpack.c.bf16 %v2341_v22, %v2337_v21  ;;  %v2343_v30 = vmax.f32 %v2910_v23, 0.0 }
 0x2cc   :  { %v2370_v32 = vpack.c.bf16 %v2342_v26, %v2338_v25  ;;  %v2344_v34 = vmax.f32 %v2911_v27, 0.0  ;;  %v2162_v35 = vpop.f32.mrb[132].mxu0 }
 0x2cd   :  { %v2371_v37 = vpack.c.bf16 %v2343_v30, %v2339_v29  ;;  %v2896_v38 = vadd.f32 %v2162_v35, %v1938_v31  ;;  %v2164_v39 = vpop.f32.mrb[133].mxu0  ;;  %v1958_v30 = vpop.permute.xlu0 %1957 }
 0x2ce   :  { %v2372_v40 = vpack.c.bf16 %v2344_v34, %v2340_v33  ;;  %v2897_v41 = vadd.f32 %v2164_v39, %v1938_v31  ;;  %v2166_v42 = vpop.f32.mrb[134].mxu0  ;;  %v2308_v43 = vpop.f32.mrb[132].mxu1  ;;  %2415 = vmatprep.subr.bf16.mxu0 %v2370_v32 }
 0x2cf   :  { %v2898_v44 = vadd.f32 %v2166_v42, %v1943_v36  ;;  %v2912_v45 = vadd.f32 %v2308_v43, %v1938_v31  ;;  %v2168_v46 = vpop.f32.mrb[135].mxu0  ;;  %v2310_v47 = vpop.f32.mrb[133].mxu1  ;;  %2416 = vmatpush1.bf16.msra.mxu0 %v2369_v28  ;;  %v2345_v51 = vmax.f32 %v2896_v38, 0.0 }
 0x2d0   :  { %v2899_v48 = vadd.f32 %v2168_v46, %v1943_v36  ;;  %v2913_v49 = vadd.f32 %v2310_v47, %v1938_v31  ;;  %v2312_v50 = vpop.f32.mrb[134].mxu1  ;;  %2466 = vmatprep.subr.bf16.mxu1 %v2372_v40  ;;  %v2346_v55 = vmax.f32 %v2897_v41, 0.0  ;;  %v1963_v35 = vpop.permute.xlu1 %1962 }
 0x2d1   :  { %v2349_v52 = vmax.f32 %v2898_v44, 0.0  ;;  %v2914_v53 = vadd.f32 %v2312_v50, %v1943_v36  ;;  %v2314_v54 = vpop.f32.mrb[135].mxu1  ;;  %2467 = vmatpush1.bf16.msra.mxu1 %v2371_v37  ;;  %v2347_v59 = vmax.f32 %v2912_v45, 0.0 }
 0x2d2   :  { %v2350_v56 = vmax.f32 %v2899_v48, 0.0  ;;  %v2915_v57 = vadd.f32 %v2314_v54, %v1943_v36  ;;  %v2348_v63 = vmax.f32 %v2913_v49, 0.0 }
 0x2d3   :  { %v2373_v58 = vpack.c.bf16 %v2349_v52, %v2345_v51  ;;  %v2351_v60 = vmax.f32 %v2914_v53, 0.0 }
 0x2d4   :  { %v2374_v62 = vpack.c.bf16 %v2350_v56, %v2346_v55  ;;  %v2352_v0 = vmax.f32 %v2915_v57, 0.0  ;;  %v2172_v1 = vpop.f32.mrb[136].mxu0 }
 0x2d5   :  { %v2375_v4 = vpack.c.bf16 %v2351_v60, %v2347_v59  ;;  %v2900_v5 = vadd.f32 %v2172_v1, %v1948_v61  ;;  %v2174_v6 = vpop.f32.mrb[137].mxu0  ;;  %v3026_v1 = vld [vmem:[%s3785_s5] sm:$0xff]  }
 0x2d6   :  { %v2376_v7 = vpack.c.bf16 %v2352_v0, %v2348_v63  ;;  %v2901_v8 = vadd.f32 %v2174_v6, %v1948_v61  ;;  %v2176_v9 = vpop.f32.mrb[138].mxu0  ;;  %v2318_v10 = vpop.f32.mrb[136].mxu1  ;;  %2417 = vmatprep.subr.bf16.mxu0 %v2374_v62 }
 0x2d7   :  { %v2902_v12 = vadd.f32 %v2176_v9, %v1953_v3  ;;  %v2916_v13 = vadd.f32 %v2318_v10, %v1948_v61  ;;  %v2178_v14 = vpop.f32.mrb[139].mxu0  ;;  %v2320_v15 = vpop.f32.mrb[137].mxu1  ;;  %2418 = vmatpush1.bf16.msra.mxu0 %v2373_v58  ;;  %v2353_v20 = vmax.f32 %v2900_v5, 0.0 }
 0x2d8   :  { %v2903_v16 = vadd.f32 %v2178_v14, %v1953_v3  ;;  %v2917_v18 = vadd.f32 %v2320_v15, %v1948_v61  ;;  %v2322_v19 = vpop.f32.mrb[138].mxu1  ;;  %2468 = vmatprep.subr.bf16.mxu1 %v2376_v7  ;;  %v2354_v24 = vmax.f32 %v2901_v8, 0.0  ;;  %v2388_v5 = vpop.permute.xlu1 %2387 }
 0x2d9   :  { %v2357_v21 = vmax.f32 %v2902_v12, 0.0  ;;  %v2918_v22 = vadd.f32 %v2322_v19, %v1953_v3  ;;  %v2324_v23 = vpop.f32.mrb[139].mxu1  ;;  %2469 = vmatpush1.bf16.msra.mxu1 %v2375_v4  ;;  %v2355_v28 = vmax.f32 %v2916_v13, 0.0  ;;  %v2398_v4 = vpop.permute.xlu0 %2397 }
 0x2da   :  { %v2358_v25 = vmax.f32 %v2903_v16, 0.0  ;;  %v2919_v26 = vadd.f32 %v2324_v23, %v1953_v3  ;;  %v2356_v32 = vmax.f32 %v2917_v18, 0.0  ;;  %v3027_v3 = vld [vmem:[%s3785_s5 + $0x8] ss:$0 sps:$4 sm:$0x33]  }
 0x2db   :  { %v2377_v27 = vpack.c.bf16 %v2357_v21, %v2353_v20  ;;  %v2359_v29 = vmax.f32 %v2918_v22, 0.0 }
 0x2dc   :  { %v2378_v31 = vpack.c.bf16 %v2358_v25, %v2354_v24  ;;  %v2360_v33 = vmax.f32 %v2919_v26, 0.0  ;;  %v2182_v34 = vpop.f32.mrb[140].mxu0 }
 0x2dd   :  { %v2379_v36 = vpack.c.bf16 %v2359_v29, %v2355_v28  ;;  %v2904_v37 = vadd.f32 %v2182_v34, %v1958_v30  ;;  %v2184_v38 = vpop.f32.mrb[141].mxu0  ;;  %v2393_v7 = vpop.permute.xlu0 %2392 }
 0x2de   :  { %v2380_v39 = vpack.c.bf16 %v2360_v33, %v2356_v32  ;;  %v2905_v40 = vadd.f32 %v2184_v38, %v1958_v30  ;;  %v2186_v41 = vpop.f32.mrb[142].mxu0  ;;  %v2328_v42 = vpop.f32.mrb[140].mxu1  ;;  %2419 = vmatprep.subr.bf16.mxu0 %v2378_v31 }
 0x2df   :  { %v2906_v43 = vadd.f32 %v2186_v41, %v1963_v35  ;;  %v2920_v44 = vadd.f32 %v2328_v42, %v1958_v30  ;;  %v2188_v45 = vpop.f32.mrb[143].mxu0  ;;  %v2330_v46 = vpop.f32.mrb[141].mxu1  ;;  %2420 = vmatpush1.bf16.msra.mxu0 %v2377_v27  ;;  %v2361_v50 = vmax.f32 %v2904_v37, 0.0 }
 0x2e0   :  { %v2907_v47 = vadd.f32 %v2188_v45, %v1963_v35  ;;  %v2921_v48 = vadd.f32 %v2330_v46, %v1958_v30  ;;  %v2332_v49 = vpop.f32.mrb[142].mxu1  ;;  %2470 = vmatprep.subr.bf16.mxu1 %v2380_v39  ;;  %v2362_v54 = vmax.f32 %v2905_v40, 0.0 }
 0x2e1   :  { %v2365_v51 = vmax.f32 %v2906_v43, 0.0  ;;  %v2922_v52 = vadd.f32 %v2332_v49, %v1963_v35  ;;  %v2334_v53 = vpop.f32.mrb[143].mxu1  ;;  %2471 = vmatpush1.bf16.msra.mxu1 %v2379_v36  ;;  %v2363_v58 = vmax.f32 %v2920_v44, 0.0 }
 0x2e2   :  { %v2366_v55 = vmax.f32 %v2907_v47, 0.0  ;;  %v2923_v56 = vadd.f32 %v2334_v53, %v1963_v35  ;;  %v2364_v61 = vmax.f32 %v2921_v48, 0.0 }
 0x2e3   :  { %v2381_v57 = vpack.c.bf16 %v2365_v51, %v2361_v50  ;;  %v2367_v59 = vmax.f32 %v2922_v52, 0.0 }
 0x2e4   :  { %v2382_v60 = vpack.c.bf16 %v2366_v55, %v2362_v54  ;;  %v2368_v62 = vmax.f32 %v2923_v56, 0.0 }
 0x2e5   :  { %v2383_v63 = vpack.c.bf16 %v2367_v59, %v2363_v58 }
 0x2e6   :  { %v2384_v0 = vpack.c.bf16 %v2368_v62, %v2364_v61  ;;  %2421 = vmatprep.subr.bf16.mxu0 %v2382_v60 }
 0x2e7   :  { %2422 = vmatpush1.bf16.msra.mxu0 %v2381_v57 }
 0x2e8   :  { %2472 = vmatprep.subr.bf16.mxu1 %v2384_v0 }
 0x2e9   :  { %2473 = vmatpush1.bf16.msra.mxu1 %v2383_v63 }
 0x2ea   :  { %2887 = vmatmul.mubr.msk.bf16.vlgmr.msra.gmra.mrb[144].mxu0 %vm2408_vm2, %v3026_v1 }
 0x2eb   :  { %2457 = vmatprep.mubr.bf16.mxu0 %v3112_v2 }
 0x2ec   :  { %2889 = vmatmul.mubr.msk.bf16.vlgmr.msra.gmra.mrb[144].mxu1 %vm2408_vm2, %v3026_v1 }
 0x2ed   :  { %2508 = vmatprep.mubr.bf16.mxu1 %v3112_v2 }
 0x2f2   :  { %2888 = vmatmul.mubr.msk.bf16.gmra.mrb[148].mxu0 %vm2408_vm2, %v3027_v3 }
 0x2f4   :  { %2890 = vmatmul.mubr.msk.bf16.gmra.mrb[148].mxu1 %vm2408_vm2, %v3027_v3 }
 0x3bd   :  { %v2449_v6 = vpop.f32.mrb[144].mxu0 }
 0x3be   :  { %v2450_v8 = vadd.f32 %v2449_v6, %v2388_v5  ;;  %v2451_v9 = vpop.f32.mrb[145].mxu0 }
 0x3bf   :  { %v2452_v10 = vadd.f32 %v2451_v9, %v2388_v5  ;;  %v2453_v12 = vpop.f32.mrb[146].mxu0  ;;  %v2500_v13 = vpop.f32.mrb[144].mxu1 }
 0x3c0   :  { %v3689_v14 = vadd.f32 %v2453_v12, %v2393_v7  ;;  %v2501_v15 = vadd.f32 %v2500_v13, %v2388_v5  ;;  %v2455_v16 = vpop.f32.mrb[147].mxu0  ;;  %v2502_v2 = vpop.f32.mrb[145].mxu1 }
 0x3c1   :  { %v3691_v18 = vadd.f32 %v2455_v16, %v2393_v7  ;;  %v2503_v19 = vadd.f32 %v2502_v2, %v2388_v5  ;;  %v2504_v20 = vpop.f32.mrb[146].mxu1  ;;  %v2535_v21 = vmax.f32 %v2450_v8, %v2452_v10 }
 0x3c2   :  { %v3693_v22 = vadd.f32 %v2504_v20, %v2393_v7  ;;  %v2506_v23 = vpop.f32.mrb[147].mxu1 }
 0x3c3   :  { %v3695_v24 = vadd.f32 %v2506_v23, %v2393_v7  ;;  %2536 = vmax.xlane.f32.xlu0 %v2535_v21  ;;  %v2639_v25 = vmax.f32 %v2501_v15, %v2503_v19  ;;  %v2538_v49 = vmax.f32 %v3689_v14, %v3691_v18 }
 0x3c5   :  { %v2459_v26 = vpop.f32.mrb[148].mxu0  ;;  %2640 = vmax.xlane.f32.xlu1 %v2639_v25  ;;  %v2642_v48 = vmax.f32 %v3693_v22, %v3695_v24 }
 0x3c6   :  { %v2460_v27 = vadd.f32 %v2459_v26, %v2398_v4  ;;  %v2461_v28 = vpop.f32.mrb[149].mxu0 }
 0x3c7   :  { %v2462_v29 = vadd.f32 %v2461_v28, %v2398_v4  ;;  %v2510_v30 = vpop.f32.mrb[148].mxu1  ;;  %v2463_v31 = vpop.f32.mrb[150].mxu0 }
 0x3c8   :  { %2525 = vst [vmem:[#allocation3 + $0x40] sm:$0xf] %v2460_v27  ;;  %v2511_v32 = vadd.f32 %v2510_v30, %v2398_v4  ;;  %v2512_v33 = vpop.f32.mrb[149].mxu1  ;;  %v2464_v34 = vpop.f32.mrb[151].mxu0 }
 0x3c9   :  { %2526 = vst [vmem:[#allocation3 + $0x48] sm:$0xf] %v2462_v29  ;;  %v2513_v35 = vadd.f32 %v2512_v33, %v2398_v4  ;;  %v2514_v36 = vpop.f32.mrb[150].mxu1 }
 0x3ca   :  { %2527 = vst [vmem:[#allocation3 + $0x50] sm:$0xf] %v2511_v32  ;;  %v2515_v37 = vpop.f32.mrb[151].mxu1 }
 0x3cb   :  { %2528 = vst [vmem:[#allocation3 + $0x58] sm:$0xf] %v2513_v35 }
 0x3cf   :  { %v2533_v38 = vld [vmem:[#allocation3 + $0x40] sm:$0xf] }
 0x3d0   :  { %v2534_v39 = vld [vmem:[#allocation3 + $0x48] sm:$0xf]  ;;  %v2542_v40 = vsel %vm2541_vm3, %v2533_v38, -inf }
 0x3d1   :  { %v2543_v41 = vsel %vm2541_vm3, %v2534_v39, -inf  ;;  %v2637_v42 = vld [vmem:[#allocation3 + $0x50] sm:$0xf] }
 0x3d2   :  { %v2544_v43 = vmax.f32 %v2542_v40, %v2543_v41  ;;  %v2638_v44 = vld [vmem:[#allocation3 + $0x58] sm:$0xf]  ;;  %v2645_v45 = vsel %vm2541_vm3, %v2637_v42, -inf }
 0x3d3   :  { %v2646_v46 = vsel %vm2541_vm3, %v2638_v44, -inf }
 0x3d4   :  { %2545 = vmax.xlane.f32.xlu1 %v2544_v43  ;;  %v2647_v47 = vmax.f32 %v2645_v45, %v2646_v46 }
 0x3d6   :  { %2648 = vmax.xlane.f32.xlu0 %v2647_v47 }
 0x3d8   :  { %2643 = vmax.xlane.f32.xlu1 %v2642_v48 }
 0x3da   :  { %2539 = vmax.xlane.f32.xlu0 %v2538_v49 }
 0x450   :  { %v2537_v50 = vpop.xlane.xlu0 %2536 }
 0x451   :  { %v2547_v51 = vsub.f32 %v2450_v8, %v2537_v50  ;;  %v2548_v52 = vsub.f32 %v2452_v10, %v2537_v50 }
 0x452   :  { %v2641_v53 = vpop.xlane.xlu1 %2640 }
 0x453   :  { %v2553_v54 = vmul.f32 1.442695, %v2547_v51  ;;  %v2555_v55 = vmul.f32 1.442695, %v2548_v52  ;;  %v2650_v56 = vsub.f32 %v2501_v15, %v2641_v53  ;;  %v2651_v57 = vsub.f32 %v2503_v19, %v2641_v53 }
 0x455   :  { %3028 = vpow2.f32 %v2553_v54  ;;  %v2656_v58 = vmul.f32 1.442695, %v2650_v56  ;;  %v2658_v59 = vmul.f32 1.442695, %v2651_v57 }
 0x456   :  { %3030 = vpow2.f32 %v2555_v55 }
 0x457   :  { %3032 = vpow2.f32 %v2656_v58 }
 0x458   :  { %3034 = vpow2.f32 %v2658_v59 }
 0x45f   :  { %v3705_v60 = vpop.eup %3028 }
 0x460   :  { %v3707_v61 = vpop.eup %3030 }
 0x461   :  { %v3709_v62 = vpop.eup %3032  ;;  %v2546_v63 = vpop.xlane.xlu1 %2545  ;;  %v2565_v0 = vadd.f32 %v3707_v61, %v3705_v60 }
 0x462   :  { %v3713_v1 = vpop.eup %3034  ;;  %v2551_v3 = vsub.f32 %v2533_v38, %v2546_v63  ;;  %v2552_v4 = vsub.f32 %v2534_v39, %v2546_v63 }
 0x463   :  { %v2649_v5 = vpop.xlane.xlu0 %2648  ;;  %2566 = vadd.xlane.f32.xlu0 %v2565_v0  ;;  %v2668_v6 = vadd.f32 %v3713_v1, %v3709_v62 }
 0x464   :  { %v2561_v7 = vmul.f32 1.442695, %v2551_v3  ;;  %v2563_v8 = vmul.f32 1.442695, %v2552_v4  ;;  %v2654_v9 = vsub.f32 %v2637_v42, %v2649_v5  ;;  %v2655_v10 = vsub.f32 %v2638_v44, %v2649_v5 }
 0x465   :  { %v2644_v12 = vpop.xlane.xlu1 %2643  ;;  %2669 = vadd.xlane.f32.xlu1 %v2668_v6 }
 0x466   :  { %3036 = vpow2.f32 %v2561_v7  ;;  %v2664_v13 = vmul.f32 1.442695, %v2654_v9  ;;  %v2666_v15 = vmul.f32 1.442695, %v2655_v10  ;;  %v2652_v16 = vsub.f32 %v3693_v22, %v2644_v12 }
 0x467   :  { %3038 = vpow2.f32 %v2563_v8  ;;  %v2653_v2 = vsub.f32 %v3695_v24, %v2644_v12  ;;  %v2540_v19 = vpop.xlane.xlu0 %2539 }
 0x468   :  { %3040 = vpow2.f32 %v2664_v13  ;;  %v2660_v20 = vmul.f32 1.442695, %v2652_v16  ;;  %v2549_v21 = vsub.f32 %v3689_v14, %v2540_v19  ;;  %v2550_v23 = vsub.f32 %v3691_v18, %v2540_v19 }
 0x469   :  { %3042 = vpow2.f32 %v2666_v15  ;;  %v2662_v25 = vmul.f32 1.442695, %v2653_v2 }
 0x46a   :  { %3044 = vpow2.f32 %v2660_v20  ;;  %v2557_v26 = vmul.f32 1.442695, %v2549_v21  ;;  %v2559_v27 = vmul.f32 1.442695, %v2550_v23  ;;  %v3114_v20 = vmov 1966171168  }
 0x46b   :  { %3046 = vpow2.f32 %v2662_v25  ;;  %v2610_v21 = vunpack.c.l.s4 %v3114_v20 }
 0x46c   :  { %3048 = vpow2.f32 %v2557_v26 }
 0x46d   :  { %3050 = vpow2.f32 %v2559_v27 }
 0x470   :  { %v3037_v28 = vpop.eup %3036 }
 0x471   :  { %v3039_v22 = vpop.eup %3038  ;;  %v2571_v29 = vsel %vm2541_vm3, %v3037_v28, 0.0 }
 0x472   :  { %v3041_v24 = vpop.eup %3040  ;;  %v2572_v30 = vsel %vm2541_vm3, %v3039_v22, 0.0 }
 0x473   :  { %v3043_v31 = vpop.eup %3042  ;;  %v2573_v32 = vadd.f32 %v2572_v30, %v2571_v29  ;;  %v2674_v14 = vsel %vm2541_vm3, %v3041_v24, 0.0  ;;  %v2611_v30 = vunpack.c.0.s8 %v2610_v21 }
 0x474   :  { %v3045_v18 = vpop.eup %3044  ;;  %v2675_v33 = vsel %vm2541_vm3, %v3043_v31, 0.0 }
 0x475   :  { %v3047_v34 = vpop.eup %3046  ;;  %2574 = vadd.xlane.f32.xlu0 %v2573_v32  ;;  %v2676_v35 = vadd.f32 %v2675_v33, %v2674_v14 }
 0x476   :  { %v3049_v36 = vpop.eup %3048  ;;  %v2671_v39 = vadd.f32 %v3047_v34, %v3045_v18 }
 0x477   :  { %v3051_v37 = vpop.eup %3050  ;;  %2677 = vadd.xlane.f32.xlu1 %v2676_v35 }
 0x478   :  { %v2568_v38 = vadd.f32 %v3051_v37, %v3049_v36 }
 0x47a   :  { %2569 = vadd.xlane.f32.xlu0 %v2568_v38 }
 0x47b   :  { %2672 = vadd.xlane.f32.xlu1 %v2671_v39 }
 0x4f0   :  { %v2567_v40 = vpop.xlane.xlu0 %2566 }
 0x4f1   :  { %3052 = vrcp.f32 %v2567_v40  ;;  %v2629_v40 = vld [vmem:[%s3780_s0] sm:$0xff] }
 0x4f2   :  { %v2670_v41 = vpop.xlane.xlu1 %2669 }
 0x4fb   :  { %v3053_v46 = vpop.eup %3052 }
 0x4fc   :  { %v2582_v52 = vmul.f32 %v3053_v46, %v3705_v60  ;;  %v2583_v53 = vmul.f32 %v3053_v46, %v3707_v61 }
 0x502   :  { %v2575_v42 = vpop.xlane.xlu0 %2574 }
 0x503   :  { %3054 = vrcp.f32 %v2575_v42 }
 0x504   :  { %3056 = vrcp.f32 %v2670_v41  ;;  %v2678_v43 = vpop.xlane.xlu1 %2677 }
 0x505   :  { %3058 = vrcp.f32 %v2678_v43 }
 0x507   :  { %v2570_v44 = vpop.xlane.xlu0 %2569 }
 0x508   :  { %3060 = vrcp.f32 %v2570_v44  ;;  %v2673_v45 = vpop.xlane.xlu1 %2672  ;;  %v2891_v44 = vld [vmem:[%s3780_s0 + $0x8] sm:$0xff]  ;;  %s3064_s0 = scalar_lea.vmem %s2740_s30, 256 }
 0x509   :  { %3062 = vrcp.f32 %v2673_v45  ;;  %p3065_p0 = scmp.ne.s32.totalorder %s2740_s30, %s3064_s0  ;;  %p3070_p2 = scmp.lt.s32.totalorder %s3064_s0, %s3064_s0 }
 0x50b   :  { %p3071_p3 = por %p3070_p2, %p3069_p1 }
 0x50d   :  { %v3055_v47 = vpop.eup %3054  ;;  %p3072_p4 = pnand %p3071_p3, %p3065_p0 }
 0x50e   :  { %v3057_v48 = vpop.eup %3056  ;;  %v2586_v49 = vmul.f32 %v3055_v47, %v3037_v28  ;;  %v2587_v50 = vmul.f32 %v3055_v47, %v3039_v22 }
 0x50f   :  { %v3059_v51 = vpop.eup %3058  ;;  %v2685_v58 = vmul.f32 %v3057_v48, %v3709_v62  ;;  %v2686_v59 = vmul.f32 %v3057_v48, %v3713_v1 }
 0x510   :  { %v2588_v54 = vsel %vm2541_vm3, %v2586_v49, -inf  ;;  %v2597_v55 = vsel %vm2541_vm3, %v2587_v50, -inf  ;;  %v2689_v56 = vmul.f32 %v3059_v51, %v3041_v24  ;;  %v2690_v57 = vmul.f32 %v3059_v51, %v3043_v31 }
 0x511   :  { %v2589_v0 = vmax.f32 %v2582_v52, %v2588_v54  ;;  %v2598_v3 = vmax.f32 %v2583_v53, %v2597_v55 }
 0x512   :  { %v3061_v63 = vpop.eup %3060  ;;  %v2691_v4 = vsel %vm2541_vm3, %v2689_v56, -inf  ;;  %v2700_v5 = vsel %vm2541_vm3, %v2690_v57, -inf }
 0x513   :  { %v3063_v60 = vpop.eup %3062  ;;  %v2692_v6 = vmax.f32 %v2685_v58, %v2691_v4  ;;  %v2701_v61 = vmax.f32 %v2686_v59, %v2700_v5  ;;  %v2584_v7 = vmul.f32 %v3061_v63, %v3049_v36  ;;  %v2585_v8 = vmul.f32 %v3061_v63, %v3051_v37 }
 0x514   :  { %v2687_v9 = vmul.f32 %v3063_v60, %v3045_v18  ;;  %v2688_v10 = vmul.f32 %v3063_v60, %v3047_v34  ;;  %v2614_v37 = vsub.s32 %v2611_v30, %v3195_v17 }
 0x515   :  { %v2590_v12 = vmax.f32 %v2589_v0, %v2584_v7  ;;  %v2599_v13 = vmax.f32 %v2598_v3, %v2585_v8 }
 0x516   :  { %v2693_v15 = vmax.f32 %v2692_v6, %v2687_v9  ;;  %v2702_v62 = vmax.f32 %v2701_v61, %v2688_v10 }
 0x517   :  { %v2591_v16 = vrot.slane %v2590_v12, 4  ;;  %v2600_v1 = vrot.slane %v2599_v13, 4 }
 0x518   :  { %v2694_v2 = vrot.slane %v2693_v15, 4  ;;  %v2703_v19 = vrot.slane %v2702_v62, 4 }
 0x519   :  { %v2592_v23 = vmax.f32 %v2590_v12, %v2591_v16  ;;  %v2601_v25 = vmax.f32 %v2599_v13, %v2600_v1 }
 0x51a   :  { %v2695_v26 = vmax.f32 %v2693_v15, %v2694_v2  ;;  %v2704_v27 = vmax.f32 %v2702_v62, %v2703_v19 }
 0x51b   :  { %v2593_v28 = vrot.slane %v2592_v23, 2  ;;  %v2602_v22 = vrot.slane %v2601_v25, 2 }
 0x51c   :  { %v2696_v29 = vrot.slane %v2695_v26, 2  ;;  %v2705_v24 = vrot.slane %v2704_v27, 2 }
 0x51d   :  { %v2594_v31 = vmax.f32 %v2592_v23, %v2593_v28  ;;  %v2603_v32 = vmax.f32 %v2601_v25, %v2602_v22 }
 0x51e   :  { %v2697_v14 = vmax.f32 %v2695_v26, %v2696_v29  ;;  %v2706_v18 = vmax.f32 %v2704_v27, %v2705_v24 }
 0x51f   :  { %v2595_v33 = vrot.slane %v2594_v31, 1  ;;  %v2604_v34 = vrot.slane %v2603_v32, 1 }
 0x520   :  { %v2698_v35 = vrot.slane %v2697_v14, 1  ;;  %v2707_v36 = vrot.slane %v2706_v18, 1 }
 0x521   :  { %v2596_v38 = vmax.f32 %v2594_v31, %v2595_v33  ;;  %v2605_v39 = vmax.f32 %v2603_v32, %v2604_v34 }
 0x522   :  { %v2699_v41 = vmax.f32 %v2697_v14, %v2698_v35  ;;  %v2708_v42 = vmax.f32 %v2706_v18, %v2707_v36 }
 0x523   :  { %v2608_v43 = vcombine.low %v2596_v38, %v2605_v39 }
 0x524   :  { %v2711_v45 = vcombine.low %v2699_v41, %v2708_v42 }
 0x525   :  { %v2615_v46 = vrot.slane %v2608_v43, %v2614_v37  ;;  %v2631_v47 = vmul.f32 %v2629_v40, %v2608_v43 }
 0x526   :  { %v2718_v17 = vrot.slane %v2711_v45, %v2614_v37  ;;  %v2731_v48 = vmul.f32 %v2891_v44, %v2711_v45 }
 0x527   :  { %2632 = vst [vmem:[#allocation4] sm:$0xff] %v2631_v47  ;;  %v2622_v50 = vrot.slane %v2615_v46, %v2614_v37 }
 0x528   :  { %2733 = vst [vmem:[#allocation4 + $0x8] sm:$0xff] %v2731_v48  ;;  %v2725_v51 = vrot.slane %v2718_v17, %v2614_v37 }
 0x529   :  { %3075 = shalt.err (!%p3072_p4)
}
 0x52a   :  { %s3076_s12 = scalar_lea.hbm %s3787_s7, 256 }
 0x52b   :  { %p3077_p5 = scmp.ne.s32.totalorder %s3787_s7, %s3076_s12  ;;  %p3080_p6 = scmp.lt.u32.totalorder %s3076_s12, %s3787_s7 }
 0x52d   :  { %p3082_p7 = pnand %p3080_p6, %p3077_p5 }
 0x52f   :  { %3085 = shalt.err (!%p3082_p7)
}
 0x530   :  { %s3117_s6 = smov 128   ;;  %s3118_s16 = smov 8   ;;  %2628 = vst.msk [vmem:[#allocation6] sm:$0x3] %vm3741_vm4, %v2622_v50  ;;  %2728 = vst.msk [vmem:[#allocation6 + $0x2] sm:$0x3] %vm3741_vm4, %v2725_v51 }
 0x531   :  { %2745 = dma.vmem_to_hbm [thread:$0]  %s2740_s30, 256, %s3787_s7, [#allocation5], %s3117_s6, %s3117_s6, %s3118_s16  }
 0x532   :  { %s3086_s19 = scalar_lea.vmem %s3745_s10, 64  ;;  %p3091_p9 = scmp.lt.s32.totalorder %s3745_s10, %s3745_s10 }
 0x533   :  { %p3087_p8 = scmp.ne.s32.totalorder %s3745_s10, %s3086_s19  ;;  %p3092_p10 = scmp.lt.s32.totalorder %s3086_s19, %s3086_s19 }
 0x535   :  { %p3093_p11 = por %p3092_p10, %p3091_p9 }
 0x537   :  { %p3094_p12 = pnand %p3093_p11, %p3087_p8 }
 0x539   :  { %3097 = shalt.err (!%p3094_p12)
}
 0x53a   :  { %s3098_s21 = scalar_lea.hbm %s3788_s8, 64 }
 0x53b   :  { %p3099_p13 = scmp.ne.s32.totalorder %s3788_s8, %s3098_s21  ;;  %p3102_p0 = scmp.lt.u32.totalorder %s3098_s21, %s3788_s8 }
 0x53d   :  { %p3104_p1 = pnand %p3102_p0, %p3099_p13 }
 0x53f   :  { %3107 = shalt.err (!%p3104_p1)
}
 0x540   :  { %s3119_s24 = smov 32   ;;  %s3120_s25 = smov 2  }
 0x541   :  { %2757 = dma.vmem_to_hbm [thread:$0]  %s3745_s10, 64, %s3788_s8, [#allocation7], %s3119_s24, %s3119_s24, %s3120_s25  }
 0x542   :  { %3108 = dma.done.wait [#allocation5], 256  }
 0x543   :  { %3109 = vsyncadd [#allocation5], 4294967040 }
 0x544   :  { %3110 = dma.done.wait [#allocation7], 64  }
 0x545   :  { %3111 = vsyncadd [#allocation7], 4294967232 }
 0x546   :  { %2764 = vsyncpa [#allocation5], 1 }
 0x547   :  { %2765 = vsyncpa [#allocation7], 1 }

</bundles_post_ra>
